<compile_context>
chip_gen: v5e
topology: v5e:2x2
jax: 0.10.0
libtpu: 0.0.40
codegen_flags: <defaults>
</compile_context>

<pallas_src>
import functools

import jax
import jax.numpy as jnp
from jax.experimental import pallas as pl
from jax.experimental.pallas import tpu as pltpu

LANE = 128        # TPU lane width: pad every feature dim to a multiple of this
SUBLANE = 8       # sublane granularity for the batch (second-minor) dim
TILE_B = 256      # preferred batch rows per grid step (fills MXU M axis)


def _round_up(n, m):
    return ((n + m - 1) // m) * m


def _pad2d(a, rows, cols):
    r, c = a.shape
    return jnp.pad(a, ((0, rows - r), (0, cols - c)))


def ae_forward_kernel(x_ref,
                      w1_ref, b1_ref,
                      w2_ref, b2_ref,
                      w3_ref, b3_ref,
                      w4_ref, b4_ref,
                      out_ref):
    """Fused encoder -> decoder -> sigmoid for one (tile_b, Dpad) batch tile.

    Matmul operands are bf16 (MXU); accumulation and all elementwise math
    (bias add / ReLU / sigmoid) stay in f32.
    """
    x = x_ref[...]                                                    # bf16

    # --- encoder ---
    h1 = jnp.dot(x, w1_ref[...], preferred_element_type=jnp.float32) + b1_ref[...]
    h1 = jnp.maximum(h1, 0.0)                                         # ReLU (f32)
    z = jnp.dot(h1.astype(jnp.bfloat16), w2_ref[...],
                preferred_element_type=jnp.float32) + b2_ref[...]
    # second encoder output (h1) is discarded: `z, _ = self.encode(x)`

    # --- decoder ---
    h2 = jnp.dot(z.astype(jnp.bfloat16), w3_ref[...],
                 preferred_element_type=jnp.float32) + b3_ref[...]
    h2 = jnp.maximum(h2, 0.0)                                         # ReLU (f32)
    logits = jnp.dot(h2.astype(jnp.bfloat16), w4_ref[...],
                     preferred_element_type=jnp.float32) + b4_ref[...]

    # --- torch.sigmoid on the decoder output (EUP) ---
    out_ref[...] = jax.nn.sigmoid(logits).astype(out_ref.dtype)


@functools.partial(jax.jit, static_argnames=("tile_b",))
def ae_forward(x, params, *, tile_b=TILE_B):
    """Runs the full AE forward as one batch-tiled Pallas call."""
    (w1, b1), (w2, b2), (w3, b3), (w4, b4) = params
    B, D = x.shape
    H = w1.shape[1]
    Z = w2.shape[1]

    # Zero-pad every feature dim to a full 128-lane multiple (exact: padded
    # rows/cols contribute 0 through matmul/ReLU; padded output lanes are
    # sliced off below).  Batch tile adapts to small B (multiple of 8) so tiny
    # inputs are not padded up to a full 256-row tile.
    Dp, Hp, Zp = (_round_up(d, LANE) for d in (D, H, Z))
    tb = min(tile_b, _round_up(B, SUBLANE))
    Bp = _round_up(B, tb)

    x_p = _pad2d(x, Bp, Dp).astype(jnp.bfloat16)
    w1_p = _pad2d(w1, Dp, Hp).astype(jnp.bfloat16)
    w2_p = _pad2d(w2, Hp, Zp).astype(jnp.bfloat16)
    w3_p = _pad2d(w3, Zp, Hp).astype(jnp.bfloat16)
    w4_p = _pad2d(w4, Hp, Dp).astype(jnp.bfloat16)
    b1_p = _pad2d(b1, 1, Hp)          # biases stay f32
    b2_p = _pad2d(b2, 1, Zp)
    b3_p = _pad2d(b3, 1, Hp)
    b4_p = _pad2d(b4, 1, Dp)

    grid = (Bp // tb,)

    # Batch-tiled x / out (auto double-buffered); weights & biases use a
    # constant index_map so they are fetched once and stay resident in VMEM.
    def const(shape):
        return pl.BlockSpec(shape, lambda i: (0, 0))

    in_specs = [
        pl.BlockSpec((tb, Dp), lambda i: (i, 0)),       # x tile
        const((Dp, Hp)), const((1, Hp)),                # W1, b1
        const((Hp, Zp)), const((1, Zp)),                # W2, b2
        const((Zp, Hp)), const((1, Hp)),                # W3, b3
        const((Hp, Dp)), const((1, Dp)),                # W4, b4
    ]
    out_specs = pl.BlockSpec((tb, Dp), lambda i: (i, 0))

    flops = 2 * Bp * (Dp * Hp + Hp * Zp + Zp * Hp + Hp * Dp)
    bytes_accessed = (
        x_p.size * 2 + Bp * Dp * 4
        + (w1_p.size + w2_p.size + w3_p.size + w4_p.size) * 2
        + (b1_p.size + b2_p.size + b3_p.size + b4_p.size) * 4)
    cost = pl.CostEstimate(flops=flops, transcendentals=Bp * Dp,
                           bytes_accessed=bytes_accessed)

    out_p = pl.pallas_call(
        ae_forward_kernel,
        out_shape=jax.ShapeDtypeStruct((Bp, Dp), jnp.float32),
        grid=grid,
        in_specs=in_specs,
        out_specs=out_specs,
        cost_estimate=cost,
        compiler_params=pltpu.CompilerParams(
            dimension_semantics=("parallel",),       # megacore sharding on v7x
            vmem_limit_bytes=64 * 1024 * 1024),
    )(x_p, w1_p, b1_p, w2_p, b2_p, w3_p, b3_p, w4_p, b4_p)

    return out_p[:B, :D]


def init_linear(key, fan_in, fan_out):
    """PyTorch-style nn.Linear init: U(-1/sqrt(fan_in), +1/sqrt(fan_in))."""
    kw, kb = jax.random.split(key)
    bound = 1.0 / jnp.sqrt(jnp.float32(fan_in))
    w = jax.random.uniform(kw, (fan_in, fan_out), jnp.float32, -bound, bound)
    b = jax.random.uniform(kb, (1, fan_out), jnp.float32, -bound, bound)
    return w, b


def reference_forward_f32(x, params):
    """Plain-JAX full-f32 reference (semantic check)."""
    (w1, b1), (w2, b2), (w3, b3), (w4, b4) = params
    h1 = jnp.maximum(x @ w1 + b1, 0.0)
    z = h1 @ w2 + b2
    h2 = jnp.maximum(z @ w3 + b3, 0.0)
    return jax.nn.sigmoid(h2 @ w4 + b4)


def reference_forward_mixed(x, params):
    """Emulates the kernel's mixed precision: bf16 matmul operands, f32 accum."""
    (w1, b1), (w2, b2), (w3, b3), (w4, b4) = params
    bf = jnp.bfloat16
    dot = functools.partial(jnp.dot, preferred_element_type=jnp.float32)
    h1 = jnp.maximum(dot(x.astype(bf), w1.astype(bf)) + b1, 0.0)
    z = dot(h1.astype(bf), w2.astype(bf)) + b2
    h2 = jnp.maximum(dot(z.astype(bf), w3.astype(bf)) + b3, 0.0)
    return jax.nn.sigmoid(dot(h2.astype(bf), w4.astype(bf)) + b4)


if __name__ == "__main__":
    # Logical model dims stay small; batch is large enough to exercise the
    # batch grid (2 tiles of 256 rows).
    B, D, H, Z = 512, 64, 32, 16

    key = jax.random.PRNGKey(0)
    kx, k1, k2, k3, k4 = jax.random.split(key, 5)

    x = jax.random.uniform(kx, (B, D), jnp.float32)   # AE inputs in [0, 1]

    params = (
        init_linear(k1, D, H),   # encoder layer 1
        init_linear(k2, H, Z),   # encoder layer 2 (latent)
        init_linear(k3, Z, H),   # decoder layer 1
        init_linear(k4, H, D),   # decoder layer 2 (reconstruction)
    )

    out = jax.block_until_ready(ae_forward(x, params))
    assert out.shape == (B, D)

    # Tight check against a mixed-precision (bf16 operand / f32 accum) reference
    ref_mixed = reference_forward_mixed(x, params)
    assert jnp.allclose(out, ref_mixed, atol=2e-5, rtol=2e-5), "mixed-precision mismatch"

    # Loose semantic check against the full-f32 reference (bf16 rounding only)
    ref_f32 = reference_forward_f32(x, params)
    assert jnp.allclose(out, ref_f32, atol=2e-2, rtol=2e-2), "semantic mismatch"

    # Small-batch path (adaptive tile) sanity check
    out_small = jax.block_until_ready(ae_forward(x[:40], params))
    assert out_small.shape == (40, D)
    assert jnp.allclose(out_small, ref_mixed[:40], atol=2e-5, rtol=2e-5)

    print("KERNEL_OK")
</pallas_src>

<mosaic_0001>
module attributes {stable_mosaic.version = 11 : i64} {
  func.func @ae_forward_kernel(%arg0: i32, %arg1: memref<256x128xbf16, #tpu.memory_space<vmem>>, %arg2: memref<128x128xbf16, #tpu.memory_space<vmem>>, %arg3: memref<1x128xf32, #tpu.memory_space<vmem>>, %arg4: memref<128x128xbf16, #tpu.memory_space<vmem>>, %arg5: memref<1x128xf32, #tpu.memory_space<vmem>>, %arg6: memref<128x128xbf16, #tpu.memory_space<vmem>>, %arg7: memref<1x128xf32, #tpu.memory_space<vmem>>, %arg8: memref<128x128xbf16, #tpu.memory_space<vmem>>, %arg9: memref<1x128xf32, #tpu.memory_space<vmem>>, %arg10: memref<256x128xf32, #tpu.memory_space<vmem>>) attributes {dimension_semantics = [#tpu.dimension_semantics<parallel>], iteration_bounds = array<i64: 2>, scalar_prefetch = 0 : i64, scratch_operands = 0 : i64, tpu.core_type = #tpu.core_type<tc>, window_params = [{transform_indices = @transform_0, window_bounds = array<i64: 256, 128>}, {pipeline_mode = #tpu.pipeline_mode<synchronous>, transform_indices = @transform_1, window_bounds = array<i64: 128, 128>}, {pipeline_mode = #tpu.pipeline_mode<synchronous>, transform_indices = @transform_2, window_bounds = array<i64: 1, 128>}, {pipeline_mode = #tpu.pipeline_mode<synchronous>, transform_indices = @transform_3, window_bounds = array<i64: 128, 128>}, {pipeline_mode = #tpu.pipeline_mode<synchronous>, transform_indices = @transform_4, window_bounds = array<i64: 1, 128>}, {pipeline_mode = #tpu.pipeline_mode<synchronous>, transform_indices = @transform_5, window_bounds = array<i64: 128, 128>}, {pipeline_mode = #tpu.pipeline_mode<synchronous>, transform_indices = @transform_6, window_bounds = array<i64: 1, 128>}, {pipeline_mode = #tpu.pipeline_mode<synchronous>, transform_indices = @transform_7, window_bounds = array<i64: 128, 128>}, {pipeline_mode = #tpu.pipeline_mode<synchronous>, transform_indices = @transform_8, window_bounds = array<i64: 1, 128>}, {transform_indices = @transform_9, window_bounds = array<i64: 256, 128>}]} {
    %c0 = arith.constant 0 : index
    %c0_0 = arith.constant 0 : index
    %0 = vector.load %arg1[%c0, %c0_0] : memref<256x128xbf16, #tpu.memory_space<vmem>>, vector<256x128xbf16>
    %c0_1 = arith.constant 0 : index
    %c0_2 = arith.constant 0 : index
    %1 = vector.load %arg2[%c0_1, %c0_2] : memref<128x128xbf16, #tpu.memory_space<vmem>>, vector<128x128xbf16>
    %cst = arith.constant dense<0.000000e+00> : vector<256x128xf32>
    %2 = tpu.matmul %0, %1, %cst {dimension_numbers = #tpu.dot_dimension_numbers<[1], [0], [0], [1], [0, 0, 1, 1], [], []>} : vector<256x128xbf16>, vector<128x128xbf16>, vector<256x128xf32> -> vector<256x128xf32>
    %c0_3 = arith.constant 0 : index
    %c0_4 = arith.constant 0 : index
    %3 = vector.load %arg3[%c0_3, %c0_4] : memref<1x128xf32, #tpu.memory_space<vmem>>, vector<1x128xf32>
    %4 = vector.broadcast %3 : vector<1x128xf32> to vector<256x128xf32>
    %5 = arith.addf %2, %4 : vector<256x128xf32>
    %cst_5 = arith.constant 0.000000e+00 : f32
    %6 = vector.broadcast %cst_5 : f32 to vector<256x128xf32>
    %7 = arith.maximumf %5, %6 : vector<256x128xf32>
    %8 = arith.truncf %7 : vector<256x128xf32> to vector<256x128xbf16>
    %c0_6 = arith.constant 0 : index
    %c0_7 = arith.constant 0 : index
    %9 = vector.load %arg4[%c0_6, %c0_7] : memref<128x128xbf16, #tpu.memory_space<vmem>>, vector<128x128xbf16>
    %cst_8 = arith.constant dense<0.000000e+00> : vector<256x128xf32>
    %10 = tpu.matmul %8, %9, %cst_8 {dimension_numbers = #tpu.dot_dimension_numbers<[1], [0], [0], [1], [0, 0, 1, 1], [], []>} : vector<256x128xbf16>, vector<128x128xbf16>, vector<256x128xf32> -> vector<256x128xf32>
    %c0_9 = arith.constant 0 : index
    %c0_10 = arith.constant 0 : index
    %11 = vector.load %arg5[%c0_9, %c0_10] : memref<1x128xf32, #tpu.memory_space<vmem>>, vector<1x128xf32>
    %12 = vector.broadcast %11 : vector<1x128xf32> to vector<256x128xf32>
    %13 = arith.addf %10, %12 : vector<256x128xf32>
    %14 = arith.truncf %13 : vector<256x128xf32> to vector<256x128xbf16>
    %c0_11 = arith.constant 0 : index
    %c0_12 = arith.constant 0 : index
    %15 = vector.load %arg6[%c0_11, %c0_12] : memref<128x128xbf16, #tpu.memory_space<vmem>>, vector<128x128xbf16>
    %cst_13 = arith.constant dense<0.000000e+00> : vector<256x128xf32>
    %16 = tpu.matmul %14, %15, %cst_13 {dimension_numbers = #tpu.dot_dimension_numbers<[1], [0], [0], [1], [0, 0, 1, 1], [], []>} : vector<256x128xbf16>, vector<128x128xbf16>, vector<256x128xf32> -> vector<256x128xf32>
    %c0_14 = arith.constant 0 : index
    %c0_15 = arith.constant 0 : index
    %17 = vector.load %arg7[%c0_14, %c0_15] : memref<1x128xf32, #tpu.memory_space<vmem>>, vector<1x128xf32>
    %18 = vector.broadcast %17 : vector<1x128xf32> to vector<256x128xf32>
    %19 = arith.addf %16, %18 : vector<256x128xf32>
    %cst_16 = arith.constant 0.000000e+00 : f32
    %20 = vector.broadcast %cst_16 : f32 to vector<256x128xf32>
    %21 = arith.maximumf %19, %20 : vector<256x128xf32>
    %22 = arith.truncf %21 : vector<256x128xf32> to vector<256x128xbf16>
    %c0_17 = arith.constant 0 : index
    %c0_18 = arith.constant 0 : index
    %23 = vector.load %arg8[%c0_17, %c0_18] : memref<128x128xbf16, #tpu.memory_space<vmem>>, vector<128x128xbf16>
    %cst_19 = arith.constant dense<0.000000e+00> : vector<256x128xf32>
    %24 = tpu.matmul %22, %23, %cst_19 {dimension_numbers = #tpu.dot_dimension_numbers<[1], [0], [0], [1], [0, 0, 1, 1], [], []>} : vector<256x128xbf16>, vector<128x128xbf16>, vector<256x128xf32> -> vector<256x128xf32>
    %c0_20 = arith.constant 0 : index
    %c0_21 = arith.constant 0 : index
    %25 = vector.load %arg9[%c0_20, %c0_21] : memref<1x128xf32, #tpu.memory_space<vmem>>, vector<1x128xf32>
    %26 = vector.broadcast %25 : vector<1x128xf32> to vector<256x128xf32>
    %27 = arith.addf %24, %26 : vector<256x128xf32>
    %28 = arith.negf %27 : vector<256x128xf32>
    %29 = math.exp %28 : vector<256x128xf32>
    %cst_22 = arith.constant 1.000000e+00 : f32
    %30 = vector.broadcast %cst_22 : f32 to vector<256x128xf32>
    %31 = arith.addf %30, %29 : vector<256x128xf32>
    %32 = arith.divf %30, %31 : vector<256x128xf32>
    %c0_23 = arith.constant 0 : index
    %c0_24 = arith.constant 0 : index
    %33 = vector.load %arg10[%c0_23, %c0_24] : memref<256x128xf32, #tpu.memory_space<vmem>>, vector<256x128xf32>
    tpu.vector_store %arg10[%c0_23, %c0_24], %32 {strides = array<i32>} : memref<256x128xf32, #tpu.memory_space<vmem>>, vector<256x128xf32>,
    return
  }
  func.func @transform_0(%arg0: i32) -> (i32, i32) {
    %c0_i32 = arith.constant 0 : i32
    %c0_i32_0 = arith.constant 0 : i32
    return %arg0, %c0_i32 : i32, i32
  }
  func.func @transform_1(%arg0: i32) -> (i32, i32) {
    %c0_i32 = arith.constant 0 : i32
    %c0_i32_0 = arith.constant 0 : i32
    %c0_i32_1 = arith.constant 0 : i32
    return %c0_i32, %c0_i32_0 : i32, i32
  }
  func.func @transform_2(%arg0: i32) -> (i32, i32) {
    %c0_i32 = arith.constant 0 : i32
    %c0_i32_0 = arith.constant 0 : i32
    %c0_i32_1 = arith.constant 0 : i32
    return %c0_i32, %c0_i32_0 : i32, i32
  }
  func.func @transform_3(%arg0: i32) -> (i32, i32) {
    %c0_i32 = arith.constant 0 : i32
    %c0_i32_0 = arith.constant 0 : i32
    %c0_i32_1 = arith.constant 0 : i32
    return %c0_i32, %c0_i32_0 : i32, i32
  }
  func.func @transform_4(%arg0: i32) -> (i32, i32) {
    %c0_i32 = arith.constant 0 : i32
    %c0_i32_0 = arith.constant 0 : i32
    %c0_i32_1 = arith.constant 0 : i32
    return %c0_i32, %c0_i32_0 : i32, i32
  }
  func.func @transform_5(%arg0: i32) -> (i32, i32) {
    %c0_i32 = arith.constant 0 : i32
    %c0_i32_0 = arith.constant 0 : i32
    %c0_i32_1 = arith.constant 0 : i32
    return %c0_i32, %c0_i32_0 : i32, i32
  }
  func.func @transform_6(%arg0: i32) -> (i32, i32) {
    %c0_i32 = arith.constant 0 : i32
    %c0_i32_0 = arith.constant 0 : i32
    %c0_i32_1 = arith.constant 0 : i32
    return %c0_i32, %c0_i32_0 : i32, i32
  }
  func.func @transform_7(%arg0: i32) -> (i32, i32) {
    %c0_i32 = arith.constant 0 : i32
    %c0_i32_0 = arith.constant 0 : i32
    %c0_i32_1 = arith.constant 0 : i32
    return %c0_i32, %c0_i32_0 : i32, i32
  }
  func.func @transform_8(%arg0: i32) -> (i32, i32) {
    %c0_i32 = arith.constant 0 : i32
    %c0_i32_0 = arith.constant 0 : i32
    %c0_i32_1 = arith.constant 0 : i32
    return %c0_i32, %c0_i32_0 : i32, i32
  }
  func.func @transform_9(%arg0: i32) -> (i32, i32) {
    %c0_i32 = arith.constant 0 : i32
    %c0_i32_0 = arith.constant 0 : i32
    return %arg0, %c0_i32 : i32, i32
  }
}

</mosaic_0001>

<bundles_post_ra>
// kernel: ae_forward.1
= control target key start
LH: loop header
LB: loop body
LE: loop exit
PB: predicated region body
PF: predicated region fallthrough
CT: control target
= control target key end

     0   :  { %s2382_s30 = smov 0   ;;  %s2704_s0 = inlined_call_operand.vmem [shape: bf16[512,128], index: 0, kind: input, shape index: {}]   ;;  %s2705_s1 = inlined_call_operand.vmem [shape: bf16[128,128], index: 1, kind: input, shape index: {}]   ;;  %s2706_s2 = inlined_call_operand.vmem [shape: f32[1,128], index: 2, kind: input, shape index: {}]   ;;  %s2707_s3 = inlined_call_operand.vmem [shape: bf16[128,128], index: 3, kind: input, shape index: {}]   ;;  %s2708_s4 = inlined_call_operand.vmem [shape: f32[1,128], index: 4, kind: input, shape index: {}]   ;;  %s2709_s5 = inlined_call_operand.vmem [shape: bf16[128,128], index: 5, kind: input, shape index: {}]   ;;  %s2710_s6 = inlined_call_operand.vmem [shape: f32[1,128], index: 6, kind: input, shape index: {}]   ;;  %s2711_s7 = inlined_call_operand.vmem [shape: bf16[128,128], index: 7, kind: input, shape index: {}]   ;;  %s2712_s8 = inlined_call_operand.vmem [shape: f32[1,128], index: 8, kind: input, shape index: {}]   ;;  %s2713_s9 = inlined_call_operand.vmem [shape: f32[512,128], index: 9, kind: output, shape index: {}]  }
   0x1 LB: > { %s1900_s10 = sadd.s32 4294967295, %s2330_s30   ;;  %p1904_p0 = scmp.ge.s32.totalorder %s2330_s30, 1  ;;  %s2330_s30 = sphi %s2382_s30, %s19_s30  }
   0x2   : > { %p288_p1 = scmp.lt.s32.totalorder %s2330_s30, 3 }
   0x4   : > { %p289_p2 = pnand %p1904_p0, %p288_p1 }
   0x5   : > { %s1905_s19 = sshll.u32 (!%p289_p2), %s1900_s10, 5 }
   0x6   : > { %292 = sbr.rel (%p289_p2) target bundleno = 878 (0x36e), region = 56  ;;  %p325_p3 = scmp.lt.s32.totalorder (!%p289_p2), %s1905_s19, 63 }
   0xb   : > { %v2158_v0 = vld [vmem:[%s2705_s1 + $0x38] sm:$0xff]  ;;  %v2157_v1 = vld [vmem:[%s2705_s1 + $0x30] sm:$0xff]  ;;  %v2156_v2 = vld [vmem:[%s2705_s1 + $0x28] sm:$0xff]  ;;  %s2715_s19 = smov (!%p325_p3, %s1905_s19), 63 }
   0xc   : > { %532 = vmatpush.bf16.msra.mxu0 %v2158_v0  ;;  %v2155_v3 = vld [vmem:[%s2705_s1 + $0x20] sm:$0xff]  ;;  %v2154_v4 = vld [vmem:[%s2705_s1 + $0x18] sm:$0xff]  ;;  %v2153_v5 = vld [vmem:[%s2705_s1 + $0x10] sm:$0xff]  ;;  %s1906_s26 = sshll.u32 %s2715_s19, 2  ;;  %s1908_s12 = sshll.u32 %s2715_s19, 3 }
   0xd   : > { %v2152_v6 = vld [vmem:[%s2705_s1 + $0x8] sm:$0xff]  ;;  %v2151_v7 = vld [vmem:[%s2705_s1] sm:$0xff]  ;;  %s2420_s11 = scalar_lea.vmem %s2704_s0, %s1906_s26  ;;  %v2166_v13 = vld [vmem:[%s2707_s3 + $0x38] sm:$0xff]  ;;  %s2624_s15 = scalar_lea.vmem %s2713_s9, %s1908_s12 }
   0xe   : > { %v2135_v8 = vld [vmem:[%s2420_s11] sm:$0xff]  ;;  %v2136_v9 = vld [vmem:[%s2420_s11 + $0x8] sm:$0xff]  ;;  %v2137_v10 = vld [vmem:[%s2420_s11 + $0x10] sm:$0xff]  ;;  %737 = vmatpush.bf16.msra.mxu1 %v2166_v13 }
   0xf   : > { %v2138_v11 = vld [vmem:[%s2420_s11 + $0x18] sm:$0xff]  ;;  %v2139_v12 = vld [vmem:[%s2420_s11 + $0x20] sm:$0xff]  ;;  %v2140_v14 = vld [vmem:[%s2420_s11 + $0x28] sm:$0xff] }
  0x10   : > { %533 = vmatpush.bf16.msra.mxu0 %v2157_v1  ;;  %v2165_v15 = vld [vmem:[%s2707_s3 + $0x30] sm:$0xff]  ;;  %v2164_v16 = vld [vmem:[%s2707_s3 + $0x28] sm:$0xff]  ;;  %v2163_v17 = vld [vmem:[%s2707_s3 + $0x20] sm:$0xff] }
  0x11   : > { %v2162_v18 = vld [vmem:[%s2707_s3 + $0x18] sm:$0xff]  ;;  %v2141_v19 = vld [vmem:[%s2420_s11 + $0x30] sm:$0xff]  ;;  %v2160_v21 = vld [vmem:[%s2707_s3 + $0x8] sm:$0xff] }
  0x12   : > { %738 = vmatpush.bf16.msra.mxu1 %v2165_v15  ;;  %v2161_v20 = vld [vmem:[%s2707_s3 + $0x10] sm:$0xff]  ;;  %v2159_v22 = vld [vmem:[%s2707_s3] sm:$0xff]  ;;  %v2142_v23 = vld [vmem:[%s2420_s11 + $0x38] sm:$0xff] }
  0x13   : > { %v2143_v24 = vld [vmem:[%s2420_s11 + $0x40] sm:$0xff]  ;;  %v2144_v33 = vld [vmem:[%s2420_s11 + $0x48] sm:$0xff]  ;;  %v2145_v41 = vld [vmem:[%s2420_s11 + $0x50] sm:$0xff] }
  0x14   : > { %534 = vmatpush.bf16.msra.mxu0 %v2156_v2  ;;  %v2458_v26 = vld [vmem:[%s2706_s2] ss:$0 sm:$0xff]  ;;  %v2146_v49 = vld [vmem:[%s2420_s11 + $0x58] sm:$0xff]  ;;  %v2148_v1 = vld [vmem:[%s2420_s11 + $0x68] sm:$0xff] }
  0x15   : > { %v2147_v57 = vld [vmem:[%s2420_s11 + $0x60] sm:$0xff]  ;;  %v2172_v13 = vld [vmem:[%s2709_s5 + $0x28] sm:$0xff] }
  0x16   : > { %739 = vmatpush.bf16.msra.mxu1 %v2164_v16 }
  0x18   : > { %535 = vmatpush.bf16.msra.mxu0 %v2155_v3 }
  0x1a   : > { %740 = vmatpush.bf16.msra.mxu1 %v2163_v17  ;;  %v2170_v17 = vld [vmem:[%s2709_s5 + $0x18] sm:$0xff] }
  0x1c   : > { %536 = vmatpush.bf16.msra.mxu0 %v2154_v4 }
  0x1e   : > { %741 = vmatpush.bf16.msra.mxu1 %v2162_v18 }
  0x20   : > { %537 = vmatpush.bf16.msra.mxu0 %v2153_v5  ;;  %v2174_v5 = vld [vmem:[%s2709_s5 + $0x38] sm:$0xff] }
  0x21   : > { %910 = vmatpush.bf16.msra.mxu2 %v2174_v5 }
  0x22   : > { %742 = vmatpush.bf16.msra.mxu1 %v2161_v20 }
  0x24   : > { %538 = vmatpush.bf16.msra.mxu0 %v2152_v6 }
  0x26   : > { %743 = vmatpush.bf16.msra.mxu1 %v2160_v21  ;;  %v2169_v21 = vld [vmem:[%s2709_s5 + $0x10] sm:$0xff] }
  0x28   : > { %539 = vmatpush.bf16.msra.mxu0 %v2151_v7 }
  0x2a   : > { %744 = vmatpush.bf16.msra.mxu1 %v2159_v22 }
  0x2b   : > { %540 = vmatmul.bf16.vlgmr.msra.gmra.mxu0 %v2135_v8 }
  0x3b   : > { %545 = vmatmul.bf16.gmra.mxu0 %v2136_v9  ;;  %v2173_v9 = vld [vmem:[%s2709_s5 + $0x30] sm:$0xff] }
  0x3c   : > { %911 = vmatpush.bf16.msra.mxu2 %v2173_v9 }
  0x40   : > { %912 = vmatpush.bf16.msra.mxu2 %v2172_v13 }
  0x4b   : > { %550 = vmatmul.bf16.gmra.mxu0 %v2137_v10 }
  0x5b   : > { %555 = vmatmul.bf16.gmra.mxu0 %v2138_v11  ;;  %v2149_v11 = vld [vmem:[%s2420_s11 + $0x70] sm:$0xff] }
  0x6b   : > { %560 = vmatmul.bf16.gmra.mxu0 %v2139_v12 }
  0x7b   : > { %565 = vmatmul.bf16.gmra.mxu0 %v2140_v14  ;;  %v2171_v14 = vld [vmem:[%s2709_s5 + $0x20] sm:$0xff] }
  0x7c   : > { %913 = vmatpush.bf16.msra.mxu2 %v2171_v14 }
  0x80   : > { %914 = vmatpush.bf16.msra.mxu2 %v2170_v17 }
  0x84   : > { %915 = vmatpush.bf16.msra.mxu2 %v2169_v21 }
  0x8b   : > { %570 = vmatmul.bf16.gmra.mxu0 %v2141_v19 }
  0x9b   : > { %575 = vmatmul.bf16.gmra.mxu0 %v2142_v23  ;;  %v2150_v23 = vld [vmem:[%s2420_s11 + $0x78] sm:$0xff] }
  0xa8   : > { %v541_v25 = vpop.f32.mrf.mxu0 }
  0xa9   : > { %v542_v27 = vadd.f32 %v2458_v26, %v541_v25  ;;  %v2168_v25 = vld [vmem:[%s2709_s5 + $0x8] sm:$0xff] }
  0xaa   : > { %916 = vmatpush.bf16.msra.mxu2 %v2168_v25 }
  0xab   : > { %580 = vmatmul.bf16.gmra.mxu0 %v2143_v24  ;;  %v621_v30 = vmax.f32 %v542_v27, 0.0  ;;  %v2167_v27 = vld [vmem:[%s2709_s5] sm:$0xff] }
  0xae   : > { %917 = vmatpush.bf16.msra.mxu2 %v2167_v27 }
  0xb0   : > { %v543_v28 = vpop.f32.mrf.mxu0 }
  0xb1   : > { %v544_v29 = vadd.f32 %v2458_v26, %v543_v28 }
  0xb3   : > { %v622_v31 = vmax.f32 %v544_v29, 0.0 }
  0xb5   : > { %v653_v32 = vpack.c.bf16 %v622_v31, %v621_v30 }
  0xb7   : > { %745 = vmatmul.bf16.vlgmr.msra.gmra.mxu1 %v653_v32 }
  0xb8   : > { %v546_v34 = vpop.f32.mrf.mxu0 }
  0xb9   : > { %v547_v35 = vadd.f32 %v2458_v26, %v546_v34 }
  0xbb   : > { %585 = vmatmul.bf16.gmra.mxu0 %v2144_v33  ;;  %v623_v38 = vmax.f32 %v547_v35, 0.0 }
  0xc0   : > { %v548_v36 = vpop.f32.mrf.mxu0 }
  0xc1   : > { %v549_v37 = vadd.f32 %v2458_v26, %v548_v36 }
  0xc3   : > { %v624_v39 = vmax.f32 %v549_v37, 0.0 }
  0xc5   : > { %v654_v40 = vpack.c.bf16 %v624_v39, %v623_v38 }
  0xc7   : > { %750 = vmatmul.bf16.gmra.mxu1 %v654_v40 }
  0xc8   : > { %v551_v42 = vpop.f32.mrf.mxu0 }
  0xc9   : > { %v552_v43 = vadd.f32 %v2458_v26, %v551_v42 }
  0xcb   : > { %590 = vmatmul.bf16.gmra.mxu0 %v2145_v41  ;;  %v625_v46 = vmax.f32 %v552_v43, 0.0  ;;  %v2512_v43 = vld [vmem:[%s2708_s4] ss:$0 sm:$0xff] }
  0xd0   : > { %v553_v44 = vpop.f32.mrf.mxu0 }
  0xd1   : > { %v554_v45 = vadd.f32 %v2458_v26, %v553_v44 }
  0xd3   : > { %v626_v47 = vmax.f32 %v554_v45, 0.0 }
  0xd5   : > { %v655_v48 = vpack.c.bf16 %v626_v47, %v625_v46 }
  0xd7   : > { %755 = vmatmul.bf16.gmra.mxu1 %v655_v48 }
  0xd8   : > { %v556_v50 = vpop.f32.mrf.mxu0 }
  0xd9   : > { %v557_v51 = vadd.f32 %v2458_v26, %v556_v50 }
  0xdb   : > { %595 = vmatmul.bf16.gmra.mxu0 %v2146_v49  ;;  %v627_v54 = vmax.f32 %v557_v51, 0.0 }
  0xe0   : > { %v558_v52 = vpop.f32.mrf.mxu0 }
  0xe1   : > { %v559_v53 = vadd.f32 %v2458_v26, %v558_v52 }
  0xe3   : > { %v628_v55 = vmax.f32 %v559_v53, 0.0 }
  0xe5   : > { %v656_v56 = vpack.c.bf16 %v628_v55, %v627_v54 }
  0xe7   : > { %760 = vmatmul.bf16.gmra.mxu1 %v656_v56 }
  0xe8   : > { %v561_v58 = vpop.f32.mrf.mxu0 }
  0xe9   : > { %v562_v59 = vadd.f32 %v2458_v26, %v561_v58 }
  0xeb   : > { %600 = vmatmul.bf16.gmra.mxu0 %v2147_v57  ;;  %v629_v62 = vmax.f32 %v562_v59, 0.0 }
  0xf0   : > { %v563_v60 = vpop.f32.mrf.mxu0 }
  0xf1   : > { %v564_v61 = vadd.f32 %v2458_v26, %v563_v60 }
  0xf3   : > { %v630_v63 = vmax.f32 %v564_v61, 0.0 }
  0xf5   : > { %v657_v0 = vpack.c.bf16 %v630_v63, %v629_v62 }
  0xf7   : > { %765 = vmatmul.bf16.gmra.mxu1 %v657_v0 }
  0xf8   : > { %v566_v2 = vpop.f32.mrf.mxu0 }
  0xf9   : > { %v567_v3 = vadd.f32 %v2458_v26, %v566_v2 }
  0xfb   : > { %605 = vmatmul.bf16.gmra.mxu0 %v2148_v1  ;;  %v631_v7 = vmax.f32 %v567_v3, 0.0 }
 0x100   : > { %v568_v4 = vpop.f32.mrf.mxu0 }
 0x101   : > { %v569_v6 = vadd.f32 %v2458_v26, %v568_v4 }
 0x103   : > { %v632_v8 = vmax.f32 %v569_v6, 0.0 }
 0x105   : > { %v658_v10 = vpack.c.bf16 %v632_v8, %v631_v7 }
 0x107   : > { %770 = vmatmul.bf16.gmra.mxu1 %v658_v10 }
 0x108   : > { %v571_v12 = vpop.f32.mrf.mxu0 }
 0x109   : > { %v572_v15 = vadd.f32 %v2458_v26, %v571_v12 }
 0x10b   : > { %610 = vmatmul.bf16.gmra.mxu0 %v2149_v11  ;;  %v633_v19 = vmax.f32 %v572_v15, 0.0 }
 0x110   : > { %v573_v16 = vpop.f32.mrf.mxu0 }
 0x111   : > { %v574_v18 = vadd.f32 %v2458_v26, %v573_v16 }
 0x113   : > { %v634_v20 = vmax.f32 %v574_v18, 0.0 }
 0x115   : > { %v659_v22 = vpack.c.bf16 %v634_v20, %v633_v19 }
 0x117   : > { %775 = vmatmul.bf16.gmra.mxu1 %v659_v22 }
 0x118   : > { %v576_v24 = vpop.f32.mrf.mxu0 }
 0x119   : > { %v577_v28 = vadd.f32 %v2458_v26, %v576_v24 }
 0x11b   : > { %615 = vmatmul.bf16.gmra.mxu0 %v2150_v23  ;;  %v635_v31 = vmax.f32 %v577_v28, 0.0 }
 0x120   : > { %v578_v29 = vpop.f32.mrf.mxu0 }
 0x121   : > { %v579_v30 = vadd.f32 %v2458_v26, %v578_v29 }
 0x123   : > { %v636_v32 = vmax.f32 %v579_v30, 0.0 }
 0x125   : > { %v660_v33 = vpack.c.bf16 %v636_v32, %v635_v31 }
 0x127   : > { %780 = vmatmul.bf16.gmra.mxu1 %v660_v33 }
 0x128   : > { %v581_v34 = vpop.f32.mrf.mxu0 }
 0x129   : > { %v582_v35 = vadd.f32 %v2458_v26, %v581_v34 }
 0x12b   : > { %v637_v38 = vmax.f32 %v582_v35, 0.0 }
 0x130   : > { %v583_v36 = vpop.f32.mrf.mxu0 }
 0x131   : > { %v584_v37 = vadd.f32 %v2458_v26, %v583_v36 }
 0x133   : > { %v638_v39 = vmax.f32 %v584_v37, 0.0 }
 0x134   : > { %v746_v40 = vpop.f32.mrf.mxu1 }
 0x135   : > { %v661_v41 = vpack.c.bf16 %v638_v39, %v637_v38  ;;  %v747_v45 = vadd.f32 %v2512_v43, %v746_v40 }
 0x137   : > { %785 = vmatmul.bf16.gmra.mxu1 %v661_v41 }
 0x138   : > { %v586_v42 = vpop.f32.mrf.mxu0 }
 0x139   : > { %v587_v47 = vadd.f32 %v2458_v26, %v586_v42 }
 0x13b   : > { %v639_v51 = vmax.f32 %v587_v47, 0.0 }
 0x13c   : > { %v748_v44 = vpop.f32.mrf.mxu1 }
 0x13d   : > { %v749_v46 = vadd.f32 %v2512_v43, %v748_v44 }
 0x13f   : > { %v826_v48 = vpack.c.bf16 %v749_v46, %v747_v45 }
 0x140   : > { %v588_v49 = vpop.f32.mrf.mxu0 }
 0x141   : > { %v589_v50 = vadd.f32 %v2458_v26, %v588_v49  ;;  %918 = vmatmul.bf16.vlgmr.msra.gmra.mxu2 %v826_v48  ;;  %v2182_v49 = vld [vmem:[%s2711_s7 + $0x38] sm:$0xff] }
 0x142   : > { %1115 = vmatpush.bf16.msra.mxu3 %v2182_v49 }
 0x143   : > { %v640_v52 = vmax.f32 %v589_v50, 0.0 }
 0x144   : > { %v751_v53 = vpop.f32.mrf.mxu1 }
 0x145   : > { %v662_v54 = vpack.c.bf16 %v640_v52, %v639_v51  ;;  %v752_v57 = vadd.f32 %v2512_v43, %v751_v53 }
 0x147   : > { %790 = vmatmul.bf16.gmra.mxu1 %v662_v54  ;;  %v2181_v54 = vld [vmem:[%s2711_s7 + $0x30] sm:$0xff] }
 0x148   : > { %v591_v55 = vpop.f32.mrf.mxu0  ;;  %1116 = vmatpush.bf16.msra.mxu3 %v2181_v54 }
 0x149   : > { %v592_v59 = vadd.f32 %v2458_v26, %v591_v55 }
 0x14b   : > { %v641_v63 = vmax.f32 %v592_v59, 0.0 }
 0x14c   : > { %v753_v56 = vpop.f32.mrf.mxu1 }
 0x14d   : > { %v754_v58 = vadd.f32 %v2512_v43, %v753_v56  ;;  %v2180_v56 = vld [vmem:[%s2711_s7 + $0x28] sm:$0xff] }
 0x14e   : > { %1117 = vmatpush.bf16.msra.mxu3 %v2180_v56 }
 0x14f   : > { %v827_v60 = vpack.c.bf16 %v754_v58, %v752_v57 }
 0x150   : > { %v593_v61 = vpop.f32.mrf.mxu0 }
 0x151   : > { %v594_v62 = vadd.f32 %v2458_v26, %v593_v61  ;;  %923 = vmatmul.bf16.gmra.mxu2 %v827_v60  ;;  %v2179_v60 = vld [vmem:[%s2711_s7 + $0x20] sm:$0xff] }
 0x152   : > { %1118 = vmatpush.bf16.msra.mxu3 %v2179_v60 }
 0x153   : > { %v642_v0 = vmax.f32 %v594_v62, 0.0 }
 0x154   : > { %v756_v1 = vpop.f32.mrf.mxu1 }
 0x155   : > { %v663_v2 = vpack.c.bf16 %v642_v0, %v641_v63  ;;  %v757_v5 = vadd.f32 %v2512_v43, %v756_v1  ;;  %v2178_v1 = vld [vmem:[%s2711_s7 + $0x18] sm:$0xff] }
 0x156   : > { %1119 = vmatpush.bf16.msra.mxu3 %v2178_v1 }
 0x157   : > { %795 = vmatmul.bf16.gmra.mxu1 %v663_v2 }
 0x158   : > { %v596_v3 = vpop.f32.mrf.mxu0 }
 0x159   : > { %v597_v7 = vadd.f32 %v2458_v26, %v596_v3 }
 0x15b   : > { %v643_v11 = vmax.f32 %v597_v7, 0.0 }
 0x15c   : > { %v758_v4 = vpop.f32.mrf.mxu1 }
 0x15d   : > { %v759_v6 = vadd.f32 %v2512_v43, %v758_v4 }
 0x15f   : > { %v828_v8 = vpack.c.bf16 %v759_v6, %v757_v5  ;;  %v2177_v6 = vld [vmem:[%s2711_s7 + $0x10] sm:$0xff] }
 0x160   : > { %v598_v9 = vpop.f32.mrf.mxu0  ;;  %1120 = vmatpush.bf16.msra.mxu3 %v2177_v6 }
 0x161   : > { %v599_v10 = vadd.f32 %v2458_v26, %v598_v9  ;;  %928 = vmatmul.bf16.gmra.mxu2 %v828_v8 }
 0x163   : > { %v644_v12 = vmax.f32 %v599_v10, 0.0  ;;  %v2175_v10 = vld [vmem:[%s2711_s7] sm:$0xff] }
 0x164   : > { %v761_v13 = vpop.f32.mrf.mxu1 }
 0x165   : > { %v664_v14 = vpack.c.bf16 %v644_v12, %v643_v11  ;;  %v762_v17 = vadd.f32 %v2512_v43, %v761_v13 }
 0x167   : > { %800 = vmatmul.bf16.gmra.mxu1 %v664_v14 }
 0x168   : > { %v601_v15 = vpop.f32.mrf.mxu0 }
 0x169   : > { %v602_v19 = vadd.f32 %v2458_v26, %v601_v15 }
 0x16b   : > { %v645_v23 = vmax.f32 %v602_v19, 0.0  ;;  %v2573_v19 = vld [vmem:[%s2710_s6] ss:$0 sm:$0xff] }
 0x16c   : > { %v763_v16 = vpop.f32.mrf.mxu1 }
 0x16d   : > { %v764_v18 = vadd.f32 %v2512_v43, %v763_v16 }
 0x16f   : > { %v829_v20 = vpack.c.bf16 %v764_v18, %v762_v17 }
 0x170   : > { %v603_v21 = vpop.f32.mrf.mxu0 }
 0x171   : > { %v604_v22 = vadd.f32 %v2458_v26, %v603_v21  ;;  %933 = vmatmul.bf16.gmra.mxu2 %v829_v20 }
 0x173   : > { %v646_v24 = vmax.f32 %v604_v22, 0.0 }
 0x174   : > { %v766_v25 = vpop.f32.mrf.mxu1 }
 0x175   : > { %v665_v27 = vpack.c.bf16 %v646_v24, %v645_v23  ;;  %v767_v30 = vadd.f32 %v2512_v43, %v766_v25 }
 0x177   : > { %805 = vmatmul.bf16.gmra.mxu1 %v665_v27 }
 0x178   : > { %v606_v28 = vpop.f32.mrf.mxu0 }
 0x179   : > { %v607_v32 = vadd.f32 %v2458_v26, %v606_v28 }
 0x17b   : > { %v647_v36 = vmax.f32 %v607_v32, 0.0 }
 0x17c   : > { %v768_v29 = vpop.f32.mrf.mxu1 }
 0x17d   : > { %v769_v31 = vadd.f32 %v2512_v43, %v768_v29 }
 0x17f   : > { %v830_v33 = vpack.c.bf16 %v769_v31, %v767_v30 }
 0x180   : > { %v608_v34 = vpop.f32.mrf.mxu0 }
 0x181   : > { %v609_v35 = vadd.f32 %v2458_v26, %v608_v34  ;;  %938 = vmatmul.bf16.gmra.mxu2 %v830_v33 }
 0x183   : > { %v648_v37 = vmax.f32 %v609_v35, 0.0 }
 0x184   : > { %v771_v38 = vpop.f32.mrf.mxu1 }
 0x185   : > { %v666_v39 = vpack.c.bf16 %v648_v37, %v647_v36  ;;  %v772_v42 = vadd.f32 %v2512_v43, %v771_v38 }
 0x187   : > { %810 = vmatmul.bf16.gmra.mxu1 %v666_v39 }
 0x188   : > { %v611_v40 = vpop.f32.mrf.mxu0 }
 0x189   : > { %v612_v45 = vadd.f32 %v2458_v26, %v611_v40 }
 0x18b   : > { %v649_v50 = vmax.f32 %v612_v45, 0.0 }
 0x18c   : > { %v773_v41 = vpop.f32.mrf.mxu1 }
 0x18d   : > { %v774_v44 = vadd.f32 %v2512_v43, %v773_v41 }
 0x18f   : > { %v831_v46 = vpack.c.bf16 %v774_v44, %v772_v42 }
 0x190   : > { %v613_v47 = vpop.f32.mrf.mxu0 }
 0x191   : > { %v614_v48 = vadd.f32 %v2458_v26, %v613_v47  ;;  %943 = vmatmul.bf16.gmra.mxu2 %v831_v46 }
 0x193   : > { %v650_v51 = vmax.f32 %v614_v48, 0.0 }
 0x194   : > { %v776_v52 = vpop.f32.mrf.mxu1 }
 0x195   : > { %v667_v53 = vpack.c.bf16 %v650_v51, %v649_v50  ;;  %v777_v58 = vadd.f32 %v2512_v43, %v776_v52 }
 0x197   : > { %815 = vmatmul.bf16.gmra.mxu1 %v667_v53 }
 0x198   : > { %v616_v55 = vpop.f32.mrf.mxu0 }
 0x199   : > { %v617_v61 = vadd.f32 %v2458_v26, %v616_v55 }
 0x19b   : > { %v651_v2 = vmax.f32 %v617_v61, 0.0 }
 0x19c   : > { %v778_v57 = vpop.f32.mrf.mxu1 }
 0x19d   : > { %v779_v59 = vadd.f32 %v2512_v43, %v778_v57 }
 0x19f   : > { %v832_v62 = vpack.c.bf16 %v779_v59, %v777_v58 }
 0x1a0   : > { %v618_v63 = vpop.f32.mrf.mxu0 }
 0x1a1   : > { %v619_v0 = vadd.f32 %v2458_v26, %v618_v63  ;;  %948 = vmatmul.bf16.gmra.mxu2 %v832_v62  ;;  %v2176_v26 = vld [vmem:[%s2711_s7 + $0x8] sm:$0xff] }
 0x1a2   : > { %1121 = vmatpush.bf16.msra.mxu3 %v2176_v26 }
 0x1a3   : > { %v652_v3 = vmax.f32 %v619_v0, 0.0 }
 0x1a4   : > { %v781_v4 = vpop.f32.mrf.mxu1 }
 0x1a5   : > { %v668_v5 = vpack.c.bf16 %v652_v3, %v651_v2  ;;  %v782_v8 = vadd.f32 %v2512_v43, %v781_v4 }
 0x1a6   : > { %1122 = vmatpush.bf16.msra.mxu3 %v2175_v10 }
 0x1a7   : > { %820 = vmatmul.bf16.gmra.mxu1 %v668_v5 }
 0x1ac   : > { %v783_v7 = vpop.f32.mrf.mxu1 }
 0x1ad   : > { %v784_v9 = vadd.f32 %v2512_v43, %v783_v7 }
 0x1af   : > { %v833_v11 = vpack.c.bf16 %v784_v9, %v782_v8 }
 0x1b1   : > { %953 = vmatmul.bf16.gmra.mxu2 %v833_v11 }
 0x1b4   : > { %v786_v12 = vpop.f32.mrf.mxu1 }
 0x1b5   : > { %v787_v14 = vadd.f32 %v2512_v43, %v786_v12 }
 0x1bc   : > { %v788_v13 = vpop.f32.mrf.mxu1 }
 0x1bd   : > { %v789_v15 = vadd.f32 %v2512_v43, %v788_v13 }
 0x1bf   : > { %v834_v16 = vpack.c.bf16 %v789_v15, %v787_v14 }
 0x1c1   : > { %958 = vmatmul.bf16.gmra.mxu2 %v834_v16 }
 0x1c4   : > { %v791_v17 = vpop.f32.mrf.mxu1  ;;  %v919_v18 = vpop.f32.mrf.mxu2 }
 0x1c5   : > { %v920_v20 = vadd.f32 %v2573_v19, %v919_v18  ;;  %v792_v23 = vadd.f32 %v2512_v43, %v791_v17 }
 0x1c7   : > { %v999_v27 = vmax.f32 %v920_v20, 0.0 }
 0x1cc   : > { %v793_v21 = vpop.f32.mrf.mxu1  ;;  %v921_v22 = vpop.f32.mrf.mxu2 }
 0x1cd   : > { %v794_v24 = vadd.f32 %v2512_v43, %v793_v21  ;;  %v922_v25 = vadd.f32 %v2573_v19, %v921_v22 }
 0x1cf   : > { %v1000_v28 = vmax.f32 %v922_v25, 0.0  ;;  %v835_v29 = vpack.c.bf16 %v794_v24, %v792_v23 }
 0x1d1   : > { %963 = vmatmul.bf16.gmra.mxu2 %v835_v29  ;;  %v1031_v30 = vpack.c.bf16 %v1000_v28, %v999_v27 }
 0x1d3   : > { %1123 = vmatmul.bf16.vlgmr.msra.gmra.mxu3 %v1031_v30 }
 0x1d4   : > { %v796_v31 = vpop.f32.mrf.mxu1  ;;  %v924_v32 = vpop.f32.mrf.mxu2 }
 0x1d5   : > { %v925_v33 = vadd.f32 %v2573_v19, %v924_v32  ;;  %v797_v36 = vadd.f32 %v2512_v43, %v796_v31 }
 0x1d7   : > { %v1001_v39 = vmax.f32 %v925_v33, 0.0 }
 0x1dc   : > { %v798_v34 = vpop.f32.mrf.mxu1  ;;  %v926_v35 = vpop.f32.mrf.mxu2 }
 0x1dd   : > { %v799_v37 = vadd.f32 %v2512_v43, %v798_v34  ;;  %v927_v38 = vadd.f32 %v2573_v19, %v926_v35 }
 0x1df   : > { %v1002_v40 = vmax.f32 %v927_v38, 0.0  ;;  %v836_v41 = vpack.c.bf16 %v799_v37, %v797_v36 }
 0x1e1   : > { %968 = vmatmul.bf16.gmra.mxu2 %v836_v41  ;;  %v1032_v42 = vpack.c.bf16 %v1002_v40, %v1001_v39 }
 0x1e3   : > { %1128 = vmatmul.bf16.gmra.mxu3 %v1032_v42 }
 0x1e4   : > { %v801_v44 = vpop.f32.mrf.mxu1  ;;  %v929_v45 = vpop.f32.mrf.mxu2 }
 0x1e5   : > { %v930_v46 = vadd.f32 %v2573_v19, %v929_v45  ;;  %v802_v49 = vadd.f32 %v2512_v43, %v801_v44 }
 0x1e7   : > { %v1003_v52 = vmax.f32 %v930_v46, 0.0 }
 0x1ec   : > { %v803_v47 = vpop.f32.mrf.mxu1  ;;  %v931_v48 = vpop.f32.mrf.mxu2 }
 0x1ed   : > { %v804_v50 = vadd.f32 %v2512_v43, %v803_v47  ;;  %v932_v51 = vadd.f32 %v2573_v19, %v931_v48 }
 0x1ef   : > { %v1004_v53 = vmax.f32 %v932_v51, 0.0  ;;  %v837_v54 = vpack.c.bf16 %v804_v50, %v802_v49 }
 0x1f1   : > { %973 = vmatmul.bf16.gmra.mxu2 %v837_v54  ;;  %v1033_v55 = vpack.c.bf16 %v1004_v53, %v1003_v52 }
 0x1f3   : > { %1133 = vmatmul.bf16.gmra.mxu3 %v1033_v55  ;;  %v2610_v55 = vld [vmem:[%s2712_s8] ss:$0 sm:$0xff] }
 0x1f4   : > { %v806_v56 = vpop.f32.mrf.mxu1  ;;  %v934_v57 = vpop.f32.mrf.mxu2 }
 0x1f5   : > { %v935_v58 = vadd.f32 %v2573_v19, %v934_v57  ;;  %v807_v61 = vadd.f32 %v2512_v43, %v806_v56 }
 0x1f7   : > { %v1005_v0 = vmax.f32 %v935_v58, 0.0 }
 0x1fc   : > { %v808_v59 = vpop.f32.mrf.mxu1  ;;  %v936_v60 = vpop.f32.mrf.mxu2 }
 0x1fd   : > { %v809_v62 = vadd.f32 %v2512_v43, %v808_v59  ;;  %v937_v63 = vadd.f32 %v2573_v19, %v936_v60 }
 0x1ff   : > { %v838_v1 = vpack.c.bf16 %v809_v62, %v807_v61  ;;  %v1006_v2 = vmax.f32 %v937_v63, 0.0 }
 0x201   : > { %978 = vmatmul.bf16.gmra.mxu2 %v838_v1  ;;  %v1034_v3 = vpack.c.bf16 %v1006_v2, %v1005_v0 }
 0x203   : > { %1138 = vmatmul.bf16.gmra.mxu3 %v1034_v3 }
 0x204   : > { %v811_v4 = vpop.f32.mrf.mxu1  ;;  %v939_v5 = vpop.f32.mrf.mxu2 }
 0x205   : > { %v940_v6 = vadd.f32 %v2573_v19, %v939_v5  ;;  %v812_v8 = vadd.f32 %v2512_v43, %v811_v4 }
 0x207   : > { %v1007_v11 = vmax.f32 %v940_v6, 0.0 }
 0x20c   : > { %v813_v26 = vpop.f32.mrf.mxu1  ;;  %v941_v7 = vpop.f32.mrf.mxu2 }
 0x20d   : > { %v814_v9 = vadd.f32 %v2512_v43, %v813_v26  ;;  %v942_v10 = vadd.f32 %v2573_v19, %v941_v7 }
 0x20f   : > { %v839_v12 = vpack.c.bf16 %v814_v9, %v812_v8  ;;  %v1008_v13 = vmax.f32 %v942_v10, 0.0 }
 0x211   : > { %983 = vmatmul.bf16.gmra.mxu2 %v839_v12  ;;  %v1035_v14 = vpack.c.bf16 %v1008_v13, %v1007_v11 }
 0x213   : > { %1143 = vmatmul.bf16.gmra.mxu3 %v1035_v14 }
 0x214   : > { %v816_v15 = vpop.f32.mrf.mxu1  ;;  %v944_v16 = vpop.f32.mrf.mxu2 }
 0x215   : > { %v945_v17 = vadd.f32 %v2573_v19, %v944_v16  ;;  %v817_v21 = vadd.f32 %v2512_v43, %v816_v15 }
 0x217   : > { %v1009_v24 = vmax.f32 %v945_v17, 0.0 }
 0x21c   : > { %v818_v18 = vpop.f32.mrf.mxu1  ;;  %v946_v20 = vpop.f32.mrf.mxu2 }
 0x21d   : > { %v819_v22 = vadd.f32 %v2512_v43, %v818_v18  ;;  %v947_v23 = vadd.f32 %v2573_v19, %v946_v20 }
 0x21f   : > { %v840_v25 = vpack.c.bf16 %v819_v22, %v817_v21  ;;  %v1010_v27 = vmax.f32 %v947_v23, 0.0 }
 0x221   : > { %988 = vmatmul.bf16.gmra.mxu2 %v840_v25  ;;  %v1036_v28 = vpack.c.bf16 %v1010_v27, %v1009_v24 }
 0x223   : > { %1148 = vmatmul.bf16.gmra.mxu3 %v1036_v28 }
 0x224   : > { %v821_v29 = vpop.f32.mrf.mxu1  ;;  %v949_v30 = vpop.f32.mrf.mxu2 }
 0x225   : > { %v950_v31 = vadd.f32 %v2573_v19, %v949_v30  ;;  %v822_v34 = vadd.f32 %v2512_v43, %v821_v29 }
 0x227   : > { %v1011_v37 = vmax.f32 %v950_v31, 0.0 }
 0x22c   : > { %v823_v32 = vpop.f32.mrf.mxu1  ;;  %v951_v33 = vpop.f32.mrf.mxu2 }
 0x22d   : > { %v824_v35 = vadd.f32 %v2512_v43, %v823_v32  ;;  %v952_v36 = vadd.f32 %v2573_v19, %v951_v33 }
 0x22f   : > { %v841_v38 = vpack.c.bf16 %v824_v35, %v822_v34  ;;  %v1012_v39 = vmax.f32 %v952_v36, 0.0 }
 0x231   : > { %993 = vmatmul.bf16.gmra.mxu2 %v841_v38  ;;  %v1037_v40 = vpack.c.bf16 %v1012_v39, %v1011_v37 }
 0x233   : > { %1153 = vmatmul.bf16.gmra.mxu3 %v1037_v40 }
 0x234   : > { %v954_v41 = vpop.f32.mrf.mxu2 }
 0x235   : > { %v955_v42 = vadd.f32 %v2573_v19, %v954_v41 }
 0x237   : > { %v1013_v46 = vmax.f32 %v955_v42, 0.0 }
 0x23c   : > { %v956_v44 = vpop.f32.mrf.mxu2 }
 0x23d   : > { %v957_v45 = vadd.f32 %v2573_v19, %v956_v44 }
 0x23f   : > { %v1014_v47 = vmax.f32 %v957_v45, 0.0 }
 0x241   : > { %v1038_v48 = vpack.c.bf16 %v1014_v47, %v1013_v46 }
 0x243   : > { %1158 = vmatmul.bf16.gmra.mxu3 %v1038_v48 }
 0x244   : > { %v959_v49 = vpop.f32.mrf.mxu2 }
 0x245   : > { %v960_v43 = vadd.f32 %v2573_v19, %v959_v49 }
 0x247   : > { %v1015_v52 = vmax.f32 %v960_v43, 0.0 }
 0x24c   : > { %v961_v50 = vpop.f32.mrf.mxu2 }
 0x24d   : > { %v962_v51 = vadd.f32 %v2573_v19, %v961_v50 }
 0x24f   : > { %v1016_v53 = vmax.f32 %v962_v51, 0.0 }
 0x251   : > { %v1039_v54 = vpack.c.bf16 %v1016_v53, %v1015_v52 }
 0x253   : > { %1163 = vmatmul.bf16.gmra.mxu3 %v1039_v54 }
 0x254   : > { %v964_v56 = vpop.f32.mrf.mxu2 }
 0x255   : > { %v965_v60 = vadd.f32 %v2573_v19, %v964_v56 }
 0x256   : > { %v1124_v57 = vpop.f32.mrf.mxu3 }
 0x257   : > { %v1125_v58 = vadd.f32 %v2610_v55, %v1124_v57  ;;  %v1017_v0 = vmax.f32 %v965_v60, 0.0 }
 0x259   : > { %v2101_v59 = vmul.f32 -1.442695, %v1125_v58 }
 0x25b   : > { %2195 = vpow2.f32 %v2101_v59 }
 0x25c   : > { %v966_v61 = vpop.f32.mrf.mxu2 }
 0x25d   : > { %v967_v62 = vadd.f32 %v2573_v19, %v966_v61 }
 0x25e   : > { %v1126_v63 = vpop.f32.mrf.mxu3 }
 0x25f   : > { %v1018_v1 = vmax.f32 %v967_v62, 0.0  ;;  %v1127_v2 = vadd.f32 %v2610_v55, %v1126_v63 }
 0x261   : > { %v2196_v3 = vpop.eup %2195  ;;  %v2102_v4 = vmul.f32 -1.442695, %v1127_v2  ;;  %v1040_v5 = vpack.c.bf16 %v1018_v1, %v1017_v0 }
 0x262   : > { %v1300_v6 = vadd.f32 1.0, %v2196_v3 }
 0x263   : > { %2197 = vpow2.f32 %v2102_v4  ;;  %1168 = vmatmul.bf16.gmra.mxu3 %v1040_v5 }
 0x264   : > { %2199 = vrcp.f32 %v1300_v6  ;;  %v969_v26 = vpop.f32.mrf.mxu2  ;;  %v1341_v18 = vand.u32 2147483647, %v1300_v6  ;;  %v1343_v20 = vand.u32 2147483648, %v1300_v6  ;;  %vm1337_vm1 = vweird.f32 %v1300_v6 }
 0x265   : > { %v970_v13 = vadd.f32 %v2573_v19, %v969_v26 }
 0x266   : > { %v1129_v7 = vpop.f32.mrf.mxu3  ;;  %v1344_v32 = vor.u32 1.1754944e-38, %v1343_v20  ;;  %vm1342_vm3 = vcmp.eq.f32.partialorder %v1341_v18, 8.507059e+37 }
 0x267   : > { %v1130_v8 = vadd.f32 %v2610_v55, %v1129_v7  ;;  %v1019_v21 = vmax.f32 %v970_v13, 0.0 }
 0x269   : > { %v2198_v9 = vpop.eup %2197  ;;  %v2103_v10 = vmul.f32 -1.442695, %v1130_v8 }
 0x26a   : > { %v2200_v11 = vpop.eup %2199  ;;  %v1301_v12 = vadd.f32 1.0, %v2198_v9 }
 0x26b   : > { %v1333_v14 = vmul.f32 %v2200_v11, %v1300_v6  ;;  %2201 = vpow2.f32 %v2103_v10  ;;  %vm1338_vm0 = vweird.f32 %v2200_v11 }
 0x26c   : > { %2203 = vrcp.f32 %v1301_v12  ;;  %v971_v15 = vpop.f32.mrf.mxu2  ;;  %vm1339_vm2 = vmor %vm1337_vm1, %vm1338_vm0  ;;  %v1358_v39 = vand.u32 2147483648, %v1301_v12  ;;  %v1356_v42 = vand.u32 2147483647, %v1301_v12  ;;  %vm1352_vm5 = vweird.f32 %v1301_v12 }
 0x26d   : > { %v1334_v16 = vsub.f32 1.0, %v1333_v14  ;;  %v972_v17 = vadd.f32 %v2573_v19, %v971_v15 }
 0x26e   : > { %v1131_v22 = vpop.f32.mrf.mxu3  ;;  %v1359_v49 = vor.u32 1.1754944e-38, %v1358_v39  ;;  %vm1357_vm7 = vcmp.eq.f32.partialorder %v1356_v42, 8.507059e+37 }
 0x26f   : > { %v1335_v23 = vmul.f32 %v2200_v11, %v1334_v16  ;;  %v1020_v24 = vmax.f32 %v972_v17, 0.0  ;;  %v1132_v25 = vadd.f32 %v2610_v55, %v1131_v22 }
 0x271   : > { %v2202_v27 = vpop.eup %2201  ;;  %v1336_v28 = vadd.f32 %v2200_v11, %v1335_v23  ;;  %v2104_v29 = vmul.f32 -1.442695, %v1132_v25  ;;  %v1041_v30 = vpack.c.bf16 %v1020_v24, %v1019_v21 }
 0x272   : > { %v2204_v31 = vpop.eup %2203  ;;  %v1302_v33 = vadd.f32 1.0, %v2202_v27 }
 0x273   : > { %v1340_v34 = vsel %vm1339_vm2, %v2200_v11, %v1336_v28  ;;  %v1348_v35 = vmul.f32 %v2204_v31, %v1301_v12  ;;  %2205 = vpow2.f32 %v2104_v29  ;;  %1173 = vmatmul.bf16.gmra.mxu3 %v1041_v30  ;;  %vm1353_vm4 = vweird.f32 %v2204_v31 }
 0x274   : > { %v1345_v36 = vsel %vm1342_vm3, %v1344_v32, %v1340_v34  ;;  %2207 = vrcp.f32 %v1302_v33  ;;  %v974_v37 = vpop.f32.mrf.mxu2  ;;  %vm1354_vm6 = vmor %vm1352_vm5, %vm1353_vm4  ;;  %v1371_v58 = vand.u32 2147483647, %v1302_v33  ;;  %v1373_v59 = vand.u32 2147483648, %v1302_v33 }
 0x275   : > { %1812 = vst [vmem:[%s2624_s15] sm:$0xff] %v1345_v36  ;;  %v1349_v38 = vsub.f32 1.0, %v1348_v35  ;;  %v975_v50 = vadd.f32 %v2573_v19, %v974_v37  ;;  %vm1367_vm9 = vweird.f32 %v1302_v33 }
 0x276   : > { %v1134_v40 = vpop.f32.mrf.mxu3  ;;  %v1374_v6 = vor.u32 1.1754944e-38, %v1373_v59  ;;  %vm1372_vm11 = vcmp.eq.f32.partialorder %v1371_v58, 8.507059e+37 }
 0x277   : > { %v1350_v41 = vmul.f32 %v2204_v31, %v1349_v38  ;;  %v1135_v44 = vadd.f32 %v2610_v55, %v1134_v40  ;;  %v1021_v60 = vmax.f32 %v975_v50, 0.0 }
 0x279   : > { %v2206_v45 = vpop.eup %2205  ;;  %v1351_v46 = vadd.f32 %v2204_v31, %v1350_v41  ;;  %v2105_v47 = vmul.f32 -1.442695, %v1135_v44 }
 0x27a   : > { %v2208_v48 = vpop.eup %2207  ;;  %v1303_v43 = vadd.f32 1.0, %v2206_v45 }
 0x27b   : > { %v1355_v51 = vsel %vm1354_vm6, %v2204_v31, %v1351_v46  ;;  %v1363_v52 = vmul.f32 %v2208_v48, %v1302_v33  ;;  %2209 = vpow2.f32 %v2105_v47  ;;  %vm1368_vm8 = vweird.f32 %v2208_v48 }
 0x27c   : > { %v1360_v53 = vsel %vm1357_vm7, %v1359_v49, %v1355_v51  ;;  %2211 = vrcp.f32 %v1303_v43  ;;  %v976_v54 = vpop.f32.mrf.mxu2  ;;  %vm1369_vm10 = vmor %vm1367_vm9, %vm1368_vm8  ;;  %v1388_v12 = vand.u32 2147483648, %v1303_v43  ;;  %v1386_v15 = vand.u32 2147483647, %v1303_v43 }
 0x27d   : > { %1813 = vst [vmem:[%s2624_s15 + $0x8] sm:$0xff] %v1360_v53  ;;  %v1364_v56 = vsub.f32 1.0, %v1363_v52  ;;  %v977_v57 = vadd.f32 %v2573_v19, %v976_v54  ;;  %vm1382_vm13 = vweird.f32 %v1303_v43 }
 0x27e   : > { %v1136_v61 = vpop.f32.mrf.mxu3  ;;  %v1389_v22 = vor.u32 1.1754944e-38, %v1388_v12  ;;  %vm1387_vm15 = vcmp.eq.f32.partialorder %v1386_v15, 8.507059e+37 }
 0x27f   : > { %v1365_v62 = vmul.f32 %v2208_v48, %v1364_v56  ;;  %v1022_v63 = vmax.f32 %v977_v57, 0.0  ;;  %v1137_v0 = vadd.f32 %v2610_v55, %v1136_v61 }
 0x281   : > { %v2210_v1 = vpop.eup %2209  ;;  %v1366_v2 = vadd.f32 %v2208_v48, %v1365_v62  ;;  %v2106_v3 = vmul.f32 -1.442695, %v1137_v0  ;;  %v1042_v4 = vpack.c.bf16 %v1022_v63, %v1021_v60 }
 0x282   : > { %v2212_v5 = vpop.eup %2211  ;;  %v1304_v26 = vadd.f32 1.0, %v2210_v1 }
 0x283   : > { %v1370_v7 = vsel %vm1369_vm10, %v2208_v48, %v1366_v2  ;;  %v1378_v8 = vmul.f32 %v2212_v5, %v1303_v43  ;;  %2213 = vpow2.f32 %v2106_v3  ;;  %1178 = vmatmul.bf16.gmra.mxu3 %v1042_v4  ;;  %vm1383_vm12 = vweird.f32 %v2212_v5 }
 0x284   : > { %v1375_v9 = vsel %vm1372_vm11, %v1374_v6, %v1370_v7  ;;  %2215 = vrcp.f32 %v1304_v26  ;;  %v979_v10 = vpop.f32.mrf.mxu2  ;;  %vm1384_vm14 = vmor %vm1382_vm13, %vm1383_vm12  ;;  %v1401_v32 = vand.u32 2147483647, %v1304_v26  ;;  %v1403_v33 = vand.u32 2147483648, %v1304_v26 }
 0x285   : > { %1814 = vst [vmem:[%s2624_s15 + $0x10] sm:$0xff] %v1375_v9  ;;  %v1379_v11 = vsub.f32 1.0, %v1378_v8  ;;  %v980_v24 = vadd.f32 %v2573_v19, %v979_v10  ;;  %vm1397_vm1 = vweird.f32 %v1304_v26 }
 0x286   : > { %v1139_v13 = vpop.f32.mrf.mxu3  ;;  %v1404_v45 = vor.u32 1.1754944e-38, %v1403_v33  ;;  %vm1402_vm3 = vcmp.eq.f32.partialorder %v1401_v32, 8.507059e+37 }
 0x287   : > { %v1380_v14 = vmul.f32 %v2212_v5, %v1379_v11  ;;  %v1140_v16 = vadd.f32 %v2610_v55, %v1139_v13  ;;  %v1023_v34 = vmax.f32 %v980_v24, 0.0 }
 0x289   : > { %v2214_v17 = vpop.eup %2213  ;;  %v1381_v18 = vadd.f32 %v2212_v5, %v1380_v14  ;;  %v2107_v20 = vmul.f32 -1.442695, %v1140_v16 }
 0x28a   : > { %v2216_v21 = vpop.eup %2215  ;;  %v1305_v23 = vadd.f32 1.0, %v2214_v17 }
 0x28b   : > { %v1385_v25 = vsel %vm1384_vm14, %v2212_v5, %v1381_v18  ;;  %v1393_v27 = vmul.f32 %v2216_v21, %v1304_v26  ;;  %2217 = vpow2.f32 %v2107_v20  ;;  %vm1398_vm0 = vweird.f32 %v2216_v21 }
 0x28c   : > { %v1390_v28 = vsel %vm1387_vm15, %v1389_v22, %v1385_v25  ;;  %2219 = vrcp.f32 %v1305_v23  ;;  %v981_v29 = vpop.f32.mrf.mxu2  ;;  %vm1399_vm2 = vmor %vm1397_vm1, %vm1398_vm0  ;;  %v1418_v51 = vand.u32 2147483648, %v1305_v23  ;;  %v1416_v54 = vand.u32 2147483647, %v1305_v23 }
 0x28d   : > { %1815 = vst [vmem:[%s2624_s15 + $0x18] sm:$0xff] %v1390_v28  ;;  %v1394_v30 = vsub.f32 1.0, %v1393_v27  ;;  %v982_v31 = vadd.f32 %v2573_v19, %v981_v29  ;;  %vm1412_vm5 = vweird.f32 %v1305_v23 }
 0x28e   : > { %v1141_v35 = vpop.f32.mrf.mxu3  ;;  %v1419_v61 = vor.u32 1.1754944e-38, %v1418_v51  ;;  %vm1417_vm7 = vcmp.eq.f32.partialorder %v1416_v54, 8.507059e+37 }
 0x28f   : > { %v1395_v36 = vmul.f32 %v2216_v21, %v1394_v30  ;;  %v1024_v37 = vmax.f32 %v982_v31, 0.0  ;;  %v1142_v38 = vadd.f32 %v2610_v55, %v1141_v35 }
 0x291   : > { %v2218_v39 = vpop.eup %2217  ;;  %v1396_v40 = vadd.f32 %v2216_v21, %v1395_v36  ;;  %v1043_v41 = vpack.c.bf16 %v1024_v37, %v1023_v34  ;;  %v2108_v42 = vmul.f32 -1.442695, %v1142_v38 }
 0x292   : > { %v2220_v44 = vpop.eup %2219  ;;  %v1306_v46 = vadd.f32 1.0, %v2218_v39 }
 0x293   : > { %v1400_v47 = vsel %vm1399_vm2, %v2216_v21, %v1396_v40  ;;  %v1408_v48 = vmul.f32 %v2220_v44, %v1305_v23  ;;  %2221 = vpow2.f32 %v2108_v42  ;;  %1183 = vmatmul.bf16.gmra.mxu3 %v1043_v41  ;;  %vm1413_vm4 = vweird.f32 %v2220_v44 }
 0x294   : > { %v1405_v49 = vsel %vm1402_vm3, %v1404_v45, %v1400_v47  ;;  %2223 = vrcp.f32 %v1306_v46  ;;  %v984_v43 = vpop.f32.mrf.mxu2  ;;  %vm1414_vm6 = vmor %vm1412_vm5, %vm1413_vm4  ;;  %v1431_v6 = vand.u32 2147483647, %v1306_v46  ;;  %v1433_v26 = vand.u32 2147483648, %v1306_v46 }
 0x295   : > { %1816 = vst [vmem:[%s2624_s15 + $0x20] sm:$0xff] %v1405_v49  ;;  %v1409_v50 = vsub.f32 1.0, %v1408_v48  ;;  %v985_v63 = vadd.f32 %v2573_v19, %v984_v43  ;;  %vm1427_vm9 = vweird.f32 %v1306_v46 }
 0x296   : > { %v1144_v52 = vpop.f32.mrf.mxu3  ;;  %v1434_v17 = vor.u32 1.1754944e-38, %v1433_v26  ;;  %vm1432_vm11 = vcmp.eq.f32.partialorder %v1431_v6, 8.507059e+37 }
 0x297   : > { %v1410_v53 = vmul.f32 %v2220_v44, %v1409_v50  ;;  %v1145_v56 = vadd.f32 %v2610_v55, %v1144_v52  ;;  %v1025_v7 = vmax.f32 %v985_v63, 0.0 }
 0x299   : > { %v2222_v57 = vpop.eup %2221  ;;  %v1411_v58 = vadd.f32 %v2220_v44, %v1410_v53  ;;  %v2109_v59 = vmul.f32 -1.442695, %v1145_v56 }
 0x29a   : > { %v2224_v60 = vpop.eup %2223  ;;  %v1307_v62 = vadd.f32 1.0, %v2222_v57 }
 0x29b   : > { %v1415_v0 = vsel %vm1414_vm6, %v2220_v44, %v1411_v58  ;;  %v1423_v1 = vmul.f32 %v2224_v60, %v1306_v46  ;;  %2225 = vpow2.f32 %v2109_v59  ;;  %vm1428_vm8 = vweird.f32 %v2224_v60 }
 0x29c   : > { %v1420_v2 = vsel %vm1417_vm7, %v1419_v61, %v1415_v0  ;;  %2227 = vrcp.f32 %v1307_v62  ;;  %v986_v3 = vpop.f32.mrf.mxu2  ;;  %vm1429_vm10 = vmor %vm1427_vm9, %vm1428_vm8  ;;  %v1448_v25 = vand.u32 2147483648, %v1307_v62  ;;  %v1446_v29 = vand.u32 2147483647, %v1307_v62 }
 0x29d   : > { %1817 = vst [vmem:[%s2624_s15 + $0x28] sm:$0xff] %v1420_v2  ;;  %v1424_v4 = vsub.f32 1.0, %v1423_v1  ;;  %v987_v5 = vadd.f32 %v2573_v19, %v986_v3  ;;  %vm1442_vm13 = vweird.f32 %v1307_v62 }
 0x29e   : > { %v1146_v8 = vpop.f32.mrf.mxu3  ;;  %v1449_v35 = vor.u32 1.1754944e-38, %v1448_v25  ;;  %vm1447_vm15 = vcmp.eq.f32.partialorder %v1446_v29, 8.507059e+37 }
 0x29f   : > { %v1425_v9 = vmul.f32 %v2224_v60, %v1424_v4  ;;  %v1026_v10 = vmax.f32 %v987_v5, 0.0  ;;  %v1147_v11 = vadd.f32 %v2610_v55, %v1146_v8 }
 0x2a1   : > { %v2226_v12 = vpop.eup %2225  ;;  %v1426_v13 = vadd.f32 %v2224_v60, %v1425_v9  ;;  %v1044_v14 = vpack.c.bf16 %v1026_v10, %v1025_v7  ;;  %v2110_v15 = vmul.f32 -1.442695, %v1147_v11 }
 0x2a2   : > { %v2228_v16 = vpop.eup %2227  ;;  %v1308_v18 = vadd.f32 1.0, %v2226_v12 }
 0x2a3   : > { %v1430_v20 = vsel %vm1429_vm10, %v2224_v60, %v1426_v13  ;;  %v1438_v21 = vmul.f32 %v2228_v16, %v1307_v62  ;;  %2229 = vpow2.f32 %v2110_v15  ;;  %1188 = vmatmul.bf16.gmra.mxu3 %v1044_v14  ;;  %vm1443_vm12 = vweird.f32 %v2228_v16 }
 0x2a4   : > { %v1435_v22 = vsel %vm1432_vm11, %v1434_v17, %v1430_v20  ;;  %2231 = vrcp.f32 %v1308_v18  ;;  %v989_v23 = vpop.f32.mrf.mxu2  ;;  %vm1444_vm14 = vmor %vm1442_vm13, %vm1443_vm12  ;;  %v1461_v45 = vand.u32 2147483647, %v1308_v18  ;;  %v1463_v46 = vand.u32 2147483648, %v1308_v18 }
 0x2a5   : > { %1818 = vst [vmem:[%s2624_s15 + $0x30] sm:$0xff] %v1435_v22  ;;  %v1439_v24 = vsub.f32 1.0, %v1438_v21  ;;  %v990_v37 = vadd.f32 %v2573_v19, %v989_v23  ;;  %vm1457_vm1 = vweird.f32 %v1308_v18 }
 0x2a6   : > { %v1149_v27 = vpop.f32.mrf.mxu3  ;;  %v1464_v57 = vor.u32 1.1754944e-38, %v1463_v46  ;;  %vm1462_vm3 = vcmp.eq.f32.partialorder %v1461_v45, 8.507059e+37 }
 0x2a7   : > { %v1440_v28 = vmul.f32 %v2228_v16, %v1439_v24  ;;  %v1150_v30 = vadd.f32 %v2610_v55, %v1149_v27  ;;  %v1027_v47 = vmax.f32 %v990_v37, 0.0 }
 0x2a9   : > { %v2230_v31 = vpop.eup %2229  ;;  %v1441_v32 = vadd.f32 %v2228_v16, %v1440_v28  ;;  %v2111_v33 = vmul.f32 -1.442695, %v1150_v30 }
 0x2aa   : > { %v2232_v34 = vpop.eup %2231  ;;  %v1309_v36 = vadd.f32 1.0, %v2230_v31 }
 0x2ab   : > { %v1445_v38 = vsel %vm1444_vm14, %v2228_v16, %v1441_v32  ;;  %v1453_v39 = vmul.f32 %v2232_v34, %v1308_v18  ;;  %2233 = vpow2.f32 %v2111_v33  ;;  %vm1458_vm0 = vweird.f32 %v2232_v34 }
 0x2ac   : > { %v1450_v40 = vsel %vm1447_vm15, %v1449_v35, %v1445_v38  ;;  %2235 = vrcp.f32 %v1309_v36  ;;  %v991_v41 = vpop.f32.mrf.mxu2  ;;  %vm1459_vm2 = vmor %vm1457_vm1, %vm1458_vm0  ;;  %v1478_v0 = vand.u32 2147483648, %v1309_v36  ;;  %v1476_v3 = vand.u32 2147483647, %v1309_v36 }
 0x2ad   : > { %1819 = vst [vmem:[%s2624_s15 + $0x38] sm:$0xff] %v1450_v40  ;;  %v1454_v42 = vsub.f32 1.0, %v1453_v39  ;;  %v992_v44 = vadd.f32 %v2573_v19, %v991_v41  ;;  %vm1472_vm5 = vweird.f32 %v1309_v36 }
 0x2ae   : > { %v1151_v48 = vpop.f32.mrf.mxu3  ;;  %v1479_v8 = vor.u32 1.1754944e-38, %v1478_v0  ;;  %vm1477_vm7 = vcmp.eq.f32.partialorder %v1476_v3, 8.507059e+37 }
 0x2af   : > { %v1455_v49 = vmul.f32 %v2232_v34, %v1454_v42  ;;  %v1028_v43 = vmax.f32 %v992_v44, 0.0  ;;  %v1152_v50 = vadd.f32 %v2610_v55, %v1151_v48 }
 0x2b1   : > { %v2234_v51 = vpop.eup %2233  ;;  %v1456_v52 = vadd.f32 %v2232_v34, %v1455_v49  ;;  %v1045_v53 = vpack.c.bf16 %v1028_v43, %v1027_v47  ;;  %v2112_v54 = vmul.f32 -1.442695, %v1152_v50 }
 0x2b2   : > { %v2236_v56 = vpop.eup %2235  ;;  %v1310_v58 = vadd.f32 1.0, %v2234_v51 }
 0x2b3   : > { %v1460_v59 = vsel %vm1459_vm2, %v2232_v34, %v1456_v52  ;;  %v1468_v60 = vmul.f32 %v2236_v56, %v1309_v36  ;;  %2237 = vpow2.f32 %v2112_v54  ;;  %1193 = vmatmul.bf16.gmra.mxu3 %v1045_v53  ;;  %vm1473_vm4 = vweird.f32 %v2236_v56 }
 0x2b4   : > { %v1465_v61 = vsel %vm1462_vm3, %v1464_v57, %v1460_v59  ;;  %2239 = vrcp.f32 %v1310_v58  ;;  %v994_v62 = vpop.f32.mrf.mxu2  ;;  %vm1474_vm6 = vmor %vm1472_vm5, %vm1473_vm4  ;;  %v1491_v17 = vand.u32 2147483647, %v1310_v58  ;;  %v1493_v18 = vand.u32 2147483648, %v1310_v58 }
 0x2b5   : > { %1820 = vst [vmem:[%s2624_s15 + $0x40] sm:$0xff] %v1465_v61  ;;  %v1469_v63 = vsub.f32 1.0, %v1468_v60  ;;  %v995_v10 = vadd.f32 %v2573_v19, %v994_v62  ;;  %vm1487_vm9 = vweird.f32 %v1310_v58 }
 0x2b6   : > { %v1154_v1 = vpop.f32.mrf.mxu3  ;;  %v1494_v31 = vor.u32 1.1754944e-38, %v1493_v18  ;;  %vm1492_vm11 = vcmp.eq.f32.partialorder %v1491_v17, 8.507059e+37 }
 0x2b7   : > { %v1470_v2 = vmul.f32 %v2236_v56, %v1469_v63  ;;  %v1155_v4 = vadd.f32 %v2610_v55, %v1154_v1  ;;  %v1029_v20 = vmax.f32 %v995_v10, 0.0 }
 0x2b9   : > { %v2238_v5 = vpop.eup %2237  ;;  %v1471_v6 = vadd.f32 %v2236_v56, %v1470_v2  ;;  %v2113_v26 = vmul.f32 -1.442695, %v1155_v4 }
 0x2ba   : > { %v2240_v7 = vpop.eup %2239  ;;  %v1311_v9 = vadd.f32 1.0, %v2238_v5 }
 0x2bb   : > { %v1475_v11 = vsel %vm1474_vm6, %v2236_v56, %v1471_v6  ;;  %v1483_v12 = vmul.f32 %v2240_v7, %v1310_v58  ;;  %2241 = vpow2.f32 %v2113_v26  ;;  %vm1488_vm8 = vweird.f32 %v2240_v7 }
 0x2bc   : > { %v1480_v13 = vsel %vm1477_vm7, %v1479_v8, %v1475_v11  ;;  %2243 = vrcp.f32 %v1311_v9  ;;  %v996_v14 = vpop.f32.mrf.mxu2  ;;  %vm1489_vm10 = vmor %vm1487_vm9, %vm1488_vm8  ;;  %v1508_v36 = vand.u32 2147483648, %v1311_v9  ;;  %v1506_v39 = vand.u32 2147483647, %v1311_v9 }
 0x2bd   : > { %1821 = vst [vmem:[%s2624_s15 + $0x48] sm:$0xff] %v1480_v13  ;;  %v1484_v15 = vsub.f32 1.0, %v1483_v12  ;;  %v997_v16 = vadd.f32 %v2573_v19, %v996_v14  ;;  %vm1502_vm13 = vweird.f32 %v1311_v9 }
 0x2be   : > { %v1156_v21 = vpop.f32.mrf.mxu3  ;;  %v1509_v46 = vor.u32 1.1754944e-38, %v1508_v36  ;;  %vm1507_vm15 = vcmp.eq.f32.partialorder %v1506_v39, 8.507059e+37 }
 0x2bf   : > { %v1485_v22 = vmul.f32 %v2240_v7, %v1484_v15  ;;  %v1030_v23 = vmax.f32 %v997_v16, 0.0  ;;  %v1157_v24 = vadd.f32 %v2610_v55, %v1156_v21 }
 0x2c1   : > { %v2242_v25 = vpop.eup %2241  ;;  %v1486_v27 = vadd.f32 %v2240_v7, %v1485_v22  ;;  %v1046_v28 = vpack.c.bf16 %v1030_v23, %v1029_v20  ;;  %v2114_v29 = vmul.f32 -1.442695, %v1157_v24 }
 0x2c2   : > { %v2244_v30 = vpop.eup %2243  ;;  %v1312_v32 = vadd.f32 1.0, %v2242_v25 }
 0x2c3   : > { %v1490_v19 = vsel %vm1489_vm10, %v2240_v7, %v1486_v27  ;;  %v1498_v33 = vmul.f32 %v2244_v30, %v1311_v9  ;;  %2245 = vpow2.f32 %v2114_v29  ;;  %1198 = vmatmul.bf16.gmra.mxu3 %v1046_v28  ;;  %vm1503_vm12 = vweird.f32 %v2244_v30 }
 0x2c4   : > { %v1495_v34 = vsel %vm1492_vm11, %v1494_v31, %v1490_v19  ;;  %2247 = vrcp.f32 %v1312_v32  ;;  %vm1504_vm14 = vmor %vm1502_vm13, %vm1503_vm12  ;;  %v1523_v51 = vand.u32 2147483648, %v1312_v32  ;;  %v1521_v54 = vand.u32 2147483647, %v1312_v32 }
 0x2c5   : > { %1822 = vst [vmem:[%s2624_s15 + $0x50] sm:$0xff] %v1495_v34  ;;  %v1499_v35 = vsub.f32 1.0, %v1498_v33  ;;  %vm1517_vm1 = vweird.f32 %v1312_v32 }
 0x2c6   : > { %v1159_v37 = vpop.f32.mrf.mxu3  ;;  %v1524_v61 = vor.u32 1.1754944e-38, %v1523_v51  ;;  %vm1522_vm3 = vcmp.eq.f32.partialorder %v1521_v54, 8.507059e+37 }
 0x2c7   : > { %v1500_v38 = vmul.f32 %v2244_v30, %v1499_v35  ;;  %v1160_v40 = vadd.f32 %v2610_v55, %v1159_v37 }
 0x2c9   : > { %v2246_v41 = vpop.eup %2245  ;;  %v1501_v42 = vadd.f32 %v2244_v30, %v1500_v38  ;;  %v2115_v44 = vmul.f32 -1.442695, %v1160_v40 }
 0x2ca   : > { %v2248_v45 = vpop.eup %2247  ;;  %v1313_v47 = vadd.f32 1.0, %v2246_v41 }
 0x2cb   : > { %v1505_v48 = vsel %vm1504_vm14, %v2244_v30, %v1501_v42  ;;  %v1513_v49 = vmul.f32 %v2248_v45, %v1312_v32  ;;  %2249 = vpow2.f32 %v2115_v44  ;;  %vm1518_vm0 = vweird.f32 %v2248_v45 }
 0x2cc   : > { %v1510_v43 = vsel %vm1507_vm15, %v1509_v46, %v1505_v48  ;;  %2251 = vrcp.f32 %v1313_v47  ;;  %vm1519_vm2 = vmor %vm1517_vm1, %vm1518_vm0  ;;  %v1538_v3 = vand.u32 2147483648, %v1313_v47  ;;  %v1536_v6 = vand.u32 2147483647, %v1313_v47 }
 0x2cd   : > { %1823 = vst [vmem:[%s2624_s15 + $0x58] sm:$0xff] %v1510_v43  ;;  %v1514_v50 = vsub.f32 1.0, %v1513_v49  ;;  %vm1532_vm5 = vweird.f32 %v1313_v47 }
 0x2ce   : > { %v1161_v52 = vpop.f32.mrf.mxu3  ;;  %v1539_v11 = vor.u32 1.1754944e-38, %v1538_v3  ;;  %vm1537_vm7 = vcmp.eq.f32.partialorder %v1536_v6, 8.507059e+37 }
 0x2cf   : > { %v1515_v53 = vmul.f32 %v2248_v45, %v1514_v50  ;;  %v1162_v56 = vadd.f32 %v2610_v55, %v1161_v52 }
 0x2d1   : > { %v2250_v57 = vpop.eup %2249  ;;  %v1516_v58 = vadd.f32 %v2248_v45, %v1515_v53  ;;  %v2116_v59 = vmul.f32 -1.442695, %v1162_v56 }
 0x2d2   : > { %v2252_v60 = vpop.eup %2251  ;;  %v1314_v62 = vadd.f32 1.0, %v2250_v57 }
 0x2d3   : > { %v1520_v63 = vsel %vm1519_vm2, %v2248_v45, %v1516_v58  ;;  %v1528_v0 = vmul.f32 %v2252_v60, %v1313_v47  ;;  %2253 = vpow2.f32 %v2116_v59  ;;  %vm1533_vm4 = vweird.f32 %v2252_v60 }
 0x2d4   : > { %v1525_v1 = vsel %vm1522_vm3, %v1524_v61, %v1520_v63  ;;  %2255 = vrcp.f32 %v1314_v62  ;;  %vm1534_vm6 = vmor %vm1532_vm5, %vm1533_vm4  ;;  %v1553_v17 = vand.u32 2147483648, %v1314_v62  ;;  %v1551_v21 = vand.u32 2147483647, %v1314_v62 }
 0x2d5   : > { %1824 = vst [vmem:[%s2624_s15 + $0x60] sm:$0xff] %v1525_v1  ;;  %v1529_v2 = vsub.f32 1.0, %v1528_v0  ;;  %vm1547_vm9 = vweird.f32 %v1314_v62 }
 0x2d6   : > { %v1164_v4 = vpop.f32.mrf.mxu3  ;;  %v1554_v28 = vor.u32 1.1754944e-38, %v1553_v17  ;;  %vm1552_vm11 = vcmp.eq.f32.partialorder %v1551_v21, 8.507059e+37 }
 0x2d7   : > { %v1530_v5 = vmul.f32 %v2252_v60, %v1529_v2  ;;  %v1165_v26 = vadd.f32 %v2610_v55, %v1164_v4 }
 0x2d9   : > { %v2254_v7 = vpop.eup %2253  ;;  %v1531_v8 = vadd.f32 %v2252_v60, %v1530_v5  ;;  %v2117_v9 = vmul.f32 -1.442695, %v1165_v26 }
 0x2da   : > { %v2256_v10 = vpop.eup %2255  ;;  %v1315_v12 = vadd.f32 1.0, %v2254_v7 }
 0x2db   : > { %v1535_v13 = vsel %vm1534_vm6, %v2252_v60, %v1531_v8  ;;  %v1543_v14 = vmul.f32 %v2256_v10, %v1314_v62  ;;  %2257 = vpow2.f32 %v2117_v9  ;;  %vm1548_vm8 = vweird.f32 %v2256_v10 }
 0x2dc   : > { %v1540_v15 = vsel %vm1537_vm7, %v1539_v11, %v1535_v13  ;;  %2259 = vrcp.f32 %v1315_v12  ;;  %vm1549_vm10 = vmor %vm1547_vm9, %vm1548_vm8  ;;  %v1568_v33 = vand.u32 2147483648, %v1315_v12  ;;  %v1566_v36 = vand.u32 2147483647, %v1315_v12 }
 0x2dd   : > { %1825 = vst [vmem:[%s2624_s15 + $0x68] sm:$0xff] %v1540_v15  ;;  %v1544_v16 = vsub.f32 1.0, %v1543_v14  ;;  %vm1562_vm13 = vweird.f32 %v1315_v12 }
 0x2de   : > { %v1166_v18 = vpop.f32.mrf.mxu3  ;;  %v1569_v42 = vor.u32 1.1754944e-38, %v1568_v33  ;;  %vm1567_vm15 = vcmp.eq.f32.partialorder %v1566_v36, 8.507059e+37 }
 0x2df   : > { %v1545_v20 = vmul.f32 %v2256_v10, %v1544_v16  ;;  %v1167_v22 = vadd.f32 %v2610_v55, %v1166_v18 }
 0x2e1   : > { %v2258_v23 = vpop.eup %2257  ;;  %v1546_v24 = vadd.f32 %v2256_v10, %v1545_v20  ;;  %v2118_v25 = vmul.f32 -1.442695, %v1167_v22 }
 0x2e2   : > { %v2260_v27 = vpop.eup %2259  ;;  %v1316_v29 = vadd.f32 1.0, %v2258_v23 }
 0x2e3   : > { %v1550_v30 = vsel %vm1549_vm10, %v2256_v10, %v1546_v24  ;;  %v1558_v31 = vmul.f32 %v2260_v27, %v1315_v12  ;;  %2261 = vpow2.f32 %v2118_v25  ;;  %vm1563_vm12 = vweird.f32 %v2260_v27 }
 0x2e4   : > { %v1555_v32 = vsel %vm1552_vm11, %v1554_v28, %v1550_v30  ;;  %2263 = vrcp.f32 %v1316_v29  ;;  %vm1564_vm14 = vmor %vm1562_vm13, %vm1563_vm12  ;;  %v1583_v49 = vand.u32 2147483648, %v1316_v29  ;;  %v1581_v51 = vand.u32 2147483647, %v1316_v29 }
 0x2e5   : > { %1826 = vst [vmem:[%s2624_s15 + $0x70] sm:$0xff] %v1555_v32  ;;  %v1559_v19 = vsub.f32 1.0, %v1558_v31  ;;  %vm1577_vm1 = vweird.f32 %v1316_v29 }
 0x2e6   : > { %v1169_v34 = vpop.f32.mrf.mxu3  ;;  %v1584_v58 = vor.u32 1.1754944e-38, %v1583_v49  ;;  %vm1582_vm3 = vcmp.eq.f32.partialorder %v1581_v51, 8.507059e+37  ;;  %v2678_v49 = vld [vmem:[%s2712_s8] ss:$0 sm:$0xff] }
 0x2e7   : > { %v1560_v35 = vmul.f32 %v2260_v27, %v1559_v19  ;;  %v1170_v37 = vadd.f32 %v2610_v55, %v1169_v34 }
 0x2e9   : > { %v2262_v38 = vpop.eup %2261  ;;  %v1561_v39 = vadd.f32 %v2260_v27, %v1560_v35  ;;  %v2119_v40 = vmul.f32 -1.442695, %v1170_v37 }
 0x2ea   : > { %v2264_v41 = vpop.eup %2263  ;;  %v1317_v44 = vadd.f32 1.0, %v2262_v38 }
 0x2eb   : > { %v1565_v45 = vsel %vm1564_vm14, %v2260_v27, %v1561_v39  ;;  %v1573_v46 = vmul.f32 %v2264_v41, %v1316_v29  ;;  %2265 = vpow2.f32 %v2119_v40  ;;  %vm1578_vm0 = vweird.f32 %v2264_v41 }
 0x2ec   : > { %v1570_v47 = vsel %vm1567_vm15, %v1569_v42, %v1565_v45  ;;  %2267 = vrcp.f32 %v1317_v44  ;;  %vm1579_vm2 = vmor %vm1577_vm1, %vm1578_vm0  ;;  %v1598_v0 = vand.u32 2147483648, %v1317_v44  ;;  %v1596_v3 = vand.u32 2147483647, %v1317_v44 }
 0x2ed   : > { %1827 = vst [vmem:[%s2624_s15 + $0x78] sm:$0xff] %v1570_v47  ;;  %v1574_v48 = vsub.f32 1.0, %v1573_v46  ;;  %vm1592_vm5 = vweird.f32 %v1317_v44 }
 0x2ee   : > { %v1171_v43 = vpop.f32.mrf.mxu3  ;;  %v1599_v8 = vor.u32 1.1754944e-38, %v1598_v0  ;;  %vm1597_vm7 = vcmp.eq.f32.partialorder %v1596_v3, 8.507059e+37 }
 0x2ef   : > { %v1575_v50 = vmul.f32 %v2264_v41, %v1574_v48  ;;  %v1172_v52 = vadd.f32 %v2610_v55, %v1171_v43 }
 0x2f1   : > { %v2266_v53 = vpop.eup %2265  ;;  %v1576_v54 = vadd.f32 %v2264_v41, %v1575_v50  ;;  %v2120_v56 = vmul.f32 -1.442695, %v1172_v52 }
 0x2f2   : > { %v2268_v57 = vpop.eup %2267  ;;  %v1318_v59 = vadd.f32 1.0, %v2266_v53 }
 0x2f3   : > { %v1580_v60 = vsel %vm1579_vm2, %v2264_v41, %v1576_v54  ;;  %v1588_v61 = vmul.f32 %v2268_v57, %v1317_v44  ;;  %2269 = vpow2.f32 %v2120_v56  ;;  %vm1593_vm4 = vweird.f32 %v2268_v57 }
 0x2f4   : > { %v1585_v62 = vsel %vm1582_vm3, %v1584_v58, %v1580_v60  ;;  %2271 = vrcp.f32 %v1318_v59  ;;  %vm1594_vm6 = vmor %vm1592_vm5, %vm1593_vm4  ;;  %v1613_v14 = vand.u32 2147483648, %v1318_v59  ;;  %v1611_v17 = vand.u32 2147483647, %v1318_v59 }
 0x2f5   : > { %1828 = vst [vmem:[%s2624_s15 + $0x80] sm:$0xff] %v1585_v62  ;;  %v1589_v63 = vsub.f32 1.0, %v1588_v61  ;;  %vm1607_vm9 = vweird.f32 %v1318_v59 }
 0x2f6   : > { %v1174_v1 = vpop.f32.mrf.mxu3  ;;  %v1614_v24 = vor.u32 1.1754944e-38, %v1613_v14  ;;  %vm1612_vm11 = vcmp.eq.f32.partialorder %v1611_v17, 8.507059e+37 }
 0x2f7   : > { %v1590_v2 = vmul.f32 %v2268_v57, %v1589_v63  ;;  %v1175_v4 = vadd.f32 %v2610_v55, %v1174_v1 }
 0x2f9   : > { %v2270_v5 = vpop.eup %2269  ;;  %v1591_v6 = vadd.f32 %v2268_v57, %v1590_v2  ;;  %v2121_v26 = vmul.f32 -1.442695, %v1175_v4 }
 0x2fa   : > { %v2272_v7 = vpop.eup %2271  ;;  %v1319_v9 = vadd.f32 1.0, %v2270_v5 }
 0x2fb   : > { %v1595_v10 = vsel %vm1594_vm6, %v2268_v57, %v1591_v6  ;;  %v1603_v11 = vmul.f32 %v2272_v7, %v1318_v59  ;;  %2273 = vpow2.f32 %v2121_v26  ;;  %vm1608_vm8 = vweird.f32 %v2272_v7 }
 0x2fc   : > { %v1600_v12 = vsel %vm1597_vm7, %v1599_v8, %v1595_v10  ;;  %2275 = vrcp.f32 %v1319_v9  ;;  %vm1609_vm10 = vmor %vm1607_vm9, %vm1608_vm8  ;;  %v1628_v31 = vand.u32 2147483648, %v1319_v9  ;;  %v1626_v33 = vand.u32 2147483647, %v1319_v9 }
 0x2fd   : > { %1829 = vst [vmem:[%s2624_s15 + $0x88] sm:$0xff] %v1600_v12  ;;  %v1604_v13 = vsub.f32 1.0, %v1603_v11  ;;  %vm1622_vm13 = vweird.f32 %v1319_v9 }
 0x2fe   : > { %v1176_v15 = vpop.f32.mrf.mxu3  ;;  %v1629_v39 = vor.u32 1.1754944e-38, %v1628_v31  ;;  %vm1627_vm15 = vcmp.eq.f32.partialorder %v1626_v33, 8.507059e+37 }
 0x2ff   : > { %v1605_v16 = vmul.f32 %v2272_v7, %v1604_v13  ;;  %v1177_v18 = vadd.f32 %v2610_v55, %v1176_v15 }
 0x301   : > { %v2274_v20 = vpop.eup %2273  ;;  %v1606_v21 = vadd.f32 %v2272_v7, %v1605_v16  ;;  %v2122_v22 = vmul.f32 -1.442695, %v1177_v18 }
 0x302   : > { %v2276_v23 = vpop.eup %2275  ;;  %v1320_v25 = vadd.f32 1.0, %v2274_v20 }
 0x303   : > { %v1610_v27 = vsel %vm1609_vm10, %v2272_v7, %v1606_v21  ;;  %v1618_v28 = vmul.f32 %v2276_v23, %v1319_v9  ;;  %2277 = vpow2.f32 %v2122_v22  ;;  %vm1623_vm12 = vweird.f32 %v2276_v23 }
 0x304   : > { %v1615_v29 = vsel %vm1612_vm11, %v1614_v24, %v1610_v27  ;;  %2279 = vrcp.f32 %v1320_v25  ;;  %vm1624_vm14 = vmor %vm1622_vm13, %vm1623_vm12  ;;  %v1643_v46 = vand.u32 2147483648, %v1320_v25  ;;  %vm1637_vm1 = vweird.f32 %v1320_v25 }
 0x305   : > { %1830 = vst [vmem:[%s2624_s15 + $0x90] sm:$0xff] %v1615_v29  ;;  %v1619_v30 = vsub.f32 1.0, %v1618_v28 }
 0x306   : > { %v1179_v32 = vpop.f32.mrf.mxu3  ;;  %v1644_v54 = vor.u32 1.1754944e-38, %v1643_v46 }
 0x307   : > { %v1620_v19 = vmul.f32 %v2276_v23, %v1619_v30  ;;  %v1180_v34 = vadd.f32 %v2610_v55, %v1179_v32  ;;  %v1641_v55 = vand.u32 2147483647, %v1320_v25 }
 0x309   : > { %v2278_v35 = vpop.eup %2277  ;;  %v1621_v36 = vadd.f32 %v2276_v23, %v1620_v19  ;;  %v2123_v37 = vmul.f32 -1.442695, %v1180_v34  ;;  %vm1642_vm3 = vcmp.eq.f32.partialorder %v1641_v55, 8.507059e+37 }
 0x30a   : > { %v2280_v38 = vpop.eup %2279  ;;  %v1321_v40 = vadd.f32 1.0, %v2278_v35 }
 0x30b   : > { %v1625_v41 = vsel %vm1624_vm14, %v2276_v23, %v1621_v36  ;;  %v1633_v42 = vmul.f32 %v2280_v38, %v1320_v25  ;;  %2281 = vpow2.f32 %v2123_v37  ;;  %vm1638_vm0 = vweird.f32 %v2280_v38 }
 0x30c   : > { %v1630_v44 = vsel %vm1627_vm15, %v1629_v39, %v1625_v41  ;;  %2283 = vrcp.f32 %v1321_v40  ;;  %vm1639_vm2 = vmor %vm1637_vm1, %vm1638_vm0  ;;  %v1658_v61 = vand.u32 2147483648, %v1321_v40  ;;  %v1656_v0 = vand.u32 2147483647, %v1321_v40 }
 0x30d   : > { %1831 = vst [vmem:[%s2624_s15 + $0x98] sm:$0xff] %v1630_v44  ;;  %v1634_v45 = vsub.f32 1.0, %v1633_v42  ;;  %vm1652_vm5 = vweird.f32 %v1321_v40 }
 0x30e   : > { %v1181_v47 = vpop.f32.mrf.mxu3  ;;  %v1659_v6 = vor.u32 1.1754944e-38, %v1658_v61  ;;  %vm1657_vm7 = vcmp.eq.f32.partialorder %v1656_v0, 8.507059e+37 }
 0x30f   : > { %v1635_v48 = vmul.f32 %v2280_v38, %v1634_v45  ;;  %v1182_v43 = vadd.f32 %v2678_v49, %v1181_v47 }
 0x311   : > { %v2282_v50 = vpop.eup %2281  ;;  %v1636_v51 = vadd.f32 %v2280_v38, %v1635_v48  ;;  %v2124_v52 = vmul.f32 -1.442695, %v1182_v43 }
 0x312   : > { %v2284_v53 = vpop.eup %2283  ;;  %v1322_v56 = vadd.f32 1.0, %v2282_v50 }
 0x313   : > { %v1640_v57 = vsel %vm1639_vm2, %v2280_v38, %v1636_v51  ;;  %v1648_v58 = vmul.f32 %v2284_v53, %v1321_v40  ;;  %2285 = vpow2.f32 %v2124_v52  ;;  %vm1653_vm4 = vweird.f32 %v2284_v53 }
 0x314   : > { %v1645_v59 = vsel %vm1642_vm3, %v1644_v54, %v1640_v57  ;;  %2287 = vrcp.f32 %v1322_v56  ;;  %vm1654_vm6 = vmor %vm1652_vm5, %vm1653_vm4  ;;  %v1673_v11 = vand.u32 2147483648, %v1322_v56  ;;  %v1671_v14 = vand.u32 2147483647, %v1322_v56 }
 0x315   : > { %1832 = vst [vmem:[%s2624_s15 + $0xa0] sm:$0xff] %v1645_v59  ;;  %v1649_v60 = vsub.f32 1.0, %v1648_v58  ;;  %vm1667_vm9 = vweird.f32 %v1322_v56 }
 0x316   : > { %v1184_v62 = vpop.f32.mrf.mxu3  ;;  %v1674_v21 = vor.u32 1.1754944e-38, %v1673_v11  ;;  %vm1672_vm11 = vcmp.eq.f32.partialorder %v1671_v14, 8.507059e+37 }
 0x317   : > { %v1650_v63 = vmul.f32 %v2284_v53, %v1649_v60  ;;  %v1185_v1 = vadd.f32 %v2678_v49, %v1184_v62 }
 0x319   : > { %v2286_v2 = vpop.eup %2285  ;;  %v1651_v3 = vadd.f32 %v2284_v53, %v1650_v63  ;;  %v2125_v4 = vmul.f32 -1.442695, %v1185_v1 }
 0x31a   : > { %v2288_v5 = vpop.eup %2287  ;;  %v1323_v26 = vadd.f32 1.0, %v2286_v2 }
 0x31b   : > { %v1655_v7 = vsel %vm1654_vm6, %v2284_v53, %v1651_v3  ;;  %v1663_v8 = vmul.f32 %v2288_v5, %v1322_v56  ;;  %2289 = vpow2.f32 %v2125_v4  ;;  %vm1668_vm8 = vweird.f32 %v2288_v5 }
 0x31c   : > { %v1660_v9 = vsel %vm1657_vm7, %v1659_v6, %v1655_v7  ;;  %2291 = vrcp.f32 %v1323_v26  ;;  %vm1669_vm10 = vmor %vm1667_vm9, %vm1668_vm8  ;;  %v1688_v28 = vand.u32 2147483648, %v1323_v26  ;;  %v1686_v31 = vand.u32 2147483647, %v1323_v26 }
 0x31d   : > { %1833 = vst [vmem:[%s2624_s15 + $0xa8] sm:$0xff] %v1660_v9  ;;  %v1664_v10 = vsub.f32 1.0, %v1663_v8  ;;  %vm1682_vm13 = vweird.f32 %v1323_v26 }
 0x31e   : > { %v1186_v12 = vpop.f32.mrf.mxu3  ;;  %v1689_v36 = vor.u32 1.1754944e-38, %v1688_v28  ;;  %vm1687_vm15 = vcmp.eq.f32.partialorder %v1686_v31, 8.507059e+37 }
 0x31f   : > { %v1665_v13 = vmul.f32 %v2288_v5, %v1664_v10  ;;  %v1187_v15 = vadd.f32 %v2678_v49, %v1186_v12 }
 0x321   : > { %v2290_v16 = vpop.eup %2289  ;;  %v1666_v17 = vadd.f32 %v2288_v5, %v1665_v13  ;;  %v2126_v18 = vmul.f32 -1.442695, %v1187_v15 }
 0x322   : > { %v2292_v20 = vpop.eup %2291  ;;  %v1324_v22 = vadd.f32 1.0, %v2290_v16 }
 0x323   : > { %v1670_v23 = vsel %vm1669_vm10, %v2288_v5, %v1666_v17  ;;  %v1678_v24 = vmul.f32 %v2292_v20, %v1323_v26  ;;  %2293 = vpow2.f32 %v2126_v18  ;;  %vm1683_vm12 = vweird.f32 %v2292_v20 }
 0x324   : > { %v1675_v25 = vsel %vm1672_vm11, %v1674_v21, %v1670_v23  ;;  %2295 = vrcp.f32 %v1324_v22  ;;  %vm1684_vm14 = vmor %vm1682_vm13, %vm1683_vm12  ;;  %v1703_v42 = vand.u32 2147483648, %v1324_v22  ;;  %v1701_v46 = vand.u32 2147483647, %v1324_v22 }
 0x325   : > { %1834 = vst [vmem:[%s2624_s15 + $0xb0] sm:$0xff] %v1675_v25  ;;  %v1679_v27 = vsub.f32 1.0, %v1678_v24  ;;  %vm1697_vm1 = vweird.f32 %v1324_v22 }
 0x326   : > { %v1189_v29 = vpop.f32.mrf.mxu3  ;;  %v1704_v51 = vor.u32 1.1754944e-38, %v1703_v42  ;;  %vm1702_vm3 = vcmp.eq.f32.partialorder %v1701_v46, 8.507059e+37 }
 0x327   : > { %v1680_v30 = vmul.f32 %v2292_v20, %v1679_v27  ;;  %v1190_v32 = vadd.f32 %v2678_v49, %v1189_v29 }
 0x329   : > { %v2294_v19 = vpop.eup %2293  ;;  %v1681_v33 = vadd.f32 %v2292_v20, %v1680_v30  ;;  %v2127_v34 = vmul.f32 -1.442695, %v1190_v32 }
 0x32a   : > { %v2296_v35 = vpop.eup %2295  ;;  %v1325_v37 = vadd.f32 1.0, %v2294_v19 }
 0x32b   : > { %v1685_v38 = vsel %vm1684_vm14, %v2292_v20, %v1681_v33  ;;  %v1693_v39 = vmul.f32 %v2296_v35, %v1324_v22  ;;  %2297 = vpow2.f32 %v2127_v34  ;;  %vm1698_vm0 = vweird.f32 %v2296_v35 }
 0x32c   : > { %v1690_v40 = vsel %vm1687_vm15, %v1689_v36, %v1685_v38  ;;  %2299 = vrcp.f32 %v1325_v37  ;;  %vm1699_vm2 = vmor %vm1697_vm1, %vm1698_vm0  ;;  %v1718_v58 = vand.u32 2147483648, %v1325_v37  ;;  %v1716_v61 = vand.u32 2147483647, %v1325_v37 }
 0x32d   : > { %1835 = vst [vmem:[%s2624_s15 + $0xb8] sm:$0xff] %v1690_v40  ;;  %v1694_v41 = vsub.f32 1.0, %v1693_v39  ;;  %vm1712_vm5 = vweird.f32 %v1325_v37 }
 0x32e   : > { %v1191_v44 = vpop.f32.mrf.mxu3  ;;  %v1719_v3 = vor.u32 1.1754944e-38, %v1718_v58  ;;  %vm1717_vm7 = vcmp.eq.f32.partialorder %v1716_v61, 8.507059e+37 }
 0x32f   : > { %v1695_v45 = vmul.f32 %v2296_v35, %v1694_v41  ;;  %v1192_v47 = vadd.f32 %v2678_v49, %v1191_v44 }
 0x331   : > { %v2298_v48 = vpop.eup %2297  ;;  %v1696_v55 = vadd.f32 %v2296_v35, %v1695_v45  ;;  %v2128_v43 = vmul.f32 -1.442695, %v1192_v47 }
 0x332   : > { %v2300_v50 = vpop.eup %2299  ;;  %v1326_v52 = vadd.f32 1.0, %v2298_v48 }
 0x333   : > { %v1700_v53 = vsel %vm1699_vm2, %v2296_v35, %v1696_v55  ;;  %v1708_v54 = vmul.f32 %v2300_v50, %v1325_v37  ;;  %2301 = vpow2.f32 %v2128_v43  ;;  %vm1713_vm4 = vweird.f32 %v2300_v50 }
 0x334   : > { %v1705_v56 = vsel %vm1702_vm3, %v1704_v51, %v1700_v53  ;;  %2303 = vrcp.f32 %v1326_v52  ;;  %vm1714_vm6 = vmor %vm1712_vm5, %vm1713_vm4  ;;  %v1733_v8 = vand.u32 2147483648, %v1326_v52  ;;  %v1731_v11 = vand.u32 2147483647, %v1326_v52 }
 0x335   : > { %1836 = vst [vmem:[%s2624_s15 + $0xc0] sm:$0xff] %v1705_v56  ;;  %v1709_v57 = vsub.f32 1.0, %v1708_v54  ;;  %vm1727_vm9 = vweird.f32 %v1326_v52 }
 0x336   : > { %v1194_v59 = vpop.f32.mrf.mxu3  ;;  %v1734_v17 = vor.u32 1.1754944e-38, %v1733_v8  ;;  %vm1732_vm11 = vcmp.eq.f32.partialorder %v1731_v11, 8.507059e+37 }
 0x337   : > { %v1710_v60 = vmul.f32 %v2300_v50, %v1709_v57  ;;  %v1195_v62 = vadd.f32 %v2678_v49, %v1194_v59 }
 0x339   : > { %v2302_v63 = vpop.eup %2301  ;;  %v1711_v0 = vadd.f32 %v2300_v50, %v1710_v60  ;;  %v2129_v1 = vmul.f32 -1.442695, %v1195_v62 }
 0x33a   : > { %v2304_v2 = vpop.eup %2303  ;;  %v1327_v4 = vadd.f32 1.0, %v2302_v63 }
 0x33b   : > { %v1715_v5 = vsel %vm1714_vm6, %v2300_v50, %v1711_v0  ;;  %v1723_v6 = vmul.f32 %v2304_v2, %v1326_v52  ;;  %2305 = vpow2.f32 %v2129_v1  ;;  %vm1728_vm8 = vweird.f32 %v2304_v2 }
 0x33c   : > { %v1720_v26 = vsel %vm1717_vm7, %v1719_v3, %v1715_v5  ;;  %2307 = vrcp.f32 %v1327_v4  ;;  %vm1729_vm10 = vmor %vm1727_vm9, %vm1728_vm8  ;;  %v1748_v24 = vand.u32 2147483648, %v1327_v4  ;;  %v1746_v28 = vand.u32 2147483647, %v1327_v4 }
 0x33d   : > { %1837 = vst [vmem:[%s2624_s15 + $0xc8] sm:$0xff] %v1720_v26  ;;  %v1724_v7 = vsub.f32 1.0, %v1723_v6  ;;  %vm1742_vm13 = vweird.f32 %v1327_v4 }
 0x33e   : > { %v1196_v9 = vpop.f32.mrf.mxu3  ;;  %v1749_v33 = vor.u32 1.1754944e-38, %v1748_v24  ;;  %vm1747_vm15 = vcmp.eq.f32.partialorder %v1746_v28, 8.507059e+37 }
 0x33f   : > { %v1725_v10 = vmul.f32 %v2304_v2, %v1724_v7  ;;  %v1197_v12 = vadd.f32 %v2678_v49, %v1196_v9 }
 0x341   : > { %v2306_v13 = vpop.eup %2305  ;;  %v1726_v14 = vadd.f32 %v2304_v2, %v1725_v10  ;;  %v2130_v15 = vmul.f32 -1.442695, %v1197_v12 }
 0x342   : > { %v2308_v16 = vpop.eup %2307  ;;  %v1328_v18 = vadd.f32 1.0, %v2306_v13 }
 0x343   : > { %v1730_v20 = vsel %vm1729_vm10, %v2304_v2, %v1726_v14  ;;  %v1738_v21 = vmul.f32 %v2308_v16, %v1327_v4  ;;  %2309 = vpow2.f32 %v2130_v15  ;;  %vm1743_vm12 = vweird.f32 %v2308_v16 }
 0x344   : > { %v1735_v22 = vsel %vm1732_vm11, %v1734_v17, %v1730_v20  ;;  %2311 = vrcp.f32 %v1328_v18  ;;  %vm1744_vm14 = vmor %vm1742_vm13, %vm1743_vm12  ;;  %v1763_v39 = vand.u32 2147483648, %v1328_v18  ;;  %v1761_v42 = vand.u32 2147483647, %v1328_v18 }
 0x345   : > { %1838 = vst [vmem:[%s2624_s15 + $0xd0] sm:$0xff] %v1735_v22  ;;  %v1739_v23 = vsub.f32 1.0, %v1738_v21  ;;  %vm1757_vm1 = vweird.f32 %v1328_v18 }
 0x346   : > { %v1199_v25 = vpop.f32.mrf.mxu3  ;;  %v1764_v55 = vor.u32 1.1754944e-38, %v1763_v39  ;;  %vm1762_vm3 = vcmp.eq.f32.partialorder %v1761_v42, 8.507059e+37 }
 0x347   : > { %v1740_v27 = vmul.f32 %v2308_v16, %v1739_v23  ;;  %v1200_v29 = vadd.f32 %v2678_v49, %v1199_v25 }
 0x349   : > { %v2310_v30 = vpop.eup %2309  ;;  %v1741_v31 = vadd.f32 %v2308_v16, %v1740_v27  ;;  %v2131_v32 = vmul.f32 -1.442695, %v1200_v29 }
 0x34a   : > { %v2312_v19 = vpop.eup %2311  ;;  %v1329_v34 = vadd.f32 1.0, %v2310_v30 }
 0x34b   : > { %v1745_v35 = vsel %vm1744_vm14, %v2308_v16, %v1741_v31  ;;  %v1753_v36 = vmul.f32 %v2312_v19, %v1328_v18  ;;  %2313 = vpow2.f32 %v2131_v32  ;;  %vm1758_vm0 = vweird.f32 %v2312_v19 }
 0x34c   : > { %v1750_v37 = vsel %vm1747_vm15, %v1749_v33, %v1745_v35  ;;  %2315 = vrcp.f32 %v1329_v34  ;;  %vm1759_vm2 = vmor %vm1757_vm1, %vm1758_vm0  ;;  %v1778_v54 = vand.u32 2147483648, %v1329_v34  ;;  %vm1772_vm5 = vweird.f32 %v1329_v34 }
 0x34d   : > { %1839 = vst [vmem:[%s2624_s15 + $0xd8] sm:$0xff] %v1750_v37  ;;  %v1754_v38 = vsub.f32 1.0, %v1753_v36 }
 0x34e   : > { %v1201_v40 = vpop.f32.mrf.mxu3  ;;  %v1779_v60 = vor.u32 1.1754944e-38, %v1778_v54 }
 0x34f   : > { %v1755_v41 = vmul.f32 %v2312_v19, %v1754_v38  ;;  %v1202_v44 = vadd.f32 %v2678_v49, %v1201_v40  ;;  %v1776_v49 = vand.u32 2147483647, %v1329_v34 }
 0x351   : > { %v2314_v45 = vpop.eup %2313  ;;  %v1756_v46 = vadd.f32 %v2312_v19, %v1755_v41  ;;  %v2132_v47 = vmul.f32 -1.442695, %v1202_v44  ;;  %vm1777_vm7 = vcmp.eq.f32.partialorder %v1776_v49, 8.507059e+37 }
 0x352   : > { %v2316_v48 = vpop.eup %2315  ;;  %v1330_v43 = vadd.f32 1.0, %v2314_v45 }
 0x353   : > { %v1760_v50 = vsel %vm1759_vm2, %v2312_v19, %v1756_v46  ;;  %v1768_v51 = vmul.f32 %v2316_v48, %v1329_v34  ;;  %2317 = vpow2.f32 %v2132_v47  ;;  %vm1773_vm4 = vweird.f32 %v2316_v48 }
 0x354   : > { %v1765_v52 = vsel %vm1762_vm3, %v1764_v55, %v1760_v50  ;;  %2319 = vrcp.f32 %v1330_v43  ;;  %vm1774_vm6 = vmor %vm1772_vm5, %vm1773_vm4  ;;  %v1793_v2 = vand.u32 2147483648, %v1330_v43  ;;  %v1791_v4 = vand.u32 2147483647, %v1330_v43 }
 0x355   : > { %1840 = vst [vmem:[%s2624_s15 + $0xe0] sm:$0xff] %v1765_v52  ;;  %v1769_v53 = vsub.f32 1.0, %v1768_v51  ;;  %vm1787_vm9 = vweird.f32 %v1330_v43 }
 0x356   : > { %v1794_v26 = vor.u32 1.1754944e-38, %v1793_v2  ;;  %vm1792_vm11 = vcmp.eq.f32.partialorder %v1791_v4, 8.507059e+37 }
 0x357   : > { %v1770_v56 = vmul.f32 %v2316_v48, %v1769_v53 }
 0x359   : > { %v2318_v57 = vpop.eup %2317  ;;  %v1771_v58 = vadd.f32 %v2316_v48, %v1770_v56 }
 0x35a   : > { %v2320_v59 = vpop.eup %2319  ;;  %v1331_v61 = vadd.f32 1.0, %v2318_v57 }
 0x35b   : > { %v1775_v62 = vsel %vm1774_vm6, %v2316_v48, %v1771_v58  ;;  %v1783_v63 = vmul.f32 %v2320_v59, %v1330_v43  ;;  %vm1788_vm8 = vweird.f32 %v2320_v59 }
 0x35c   : > { %v1780_v0 = vsel %vm1777_vm7, %v1779_v60, %v1775_v62  ;;  %2321 = vrcp.f32 %v1331_v61  ;;  %vm1789_vm10 = vmor %vm1787_vm9, %vm1788_vm8  ;;  %v1808_v11 = vand.u32 2147483648, %v1331_v61  ;;  %v1806_v13 = vand.u32 2147483647, %v1331_v61 }
 0x35d   : > { %1841 = vst [vmem:[%s2624_s15 + $0xe8] sm:$0xff] %v1780_v0  ;;  %v1784_v1 = vsub.f32 1.0, %v1783_v63  ;;  %vm1802_vm13 = vweird.f32 %v1331_v61 }
 0x35e   : > { %v1809_v15 = vor.u32 1.1754944e-38, %v1808_v11  ;;  %vm1807_vm15 = vcmp.eq.f32.partialorder %v1806_v13, 8.507059e+37 }
 0x35f   : > { %v1785_v3 = vmul.f32 %v2320_v59, %v1784_v1 }
 0x361   : > { %v1786_v5 = vadd.f32 %v2320_v59, %v1785_v3 }
 0x362   : > { %v2322_v6 = vpop.eup %2321 }
 0x363   : > { %v1790_v7 = vsel %vm1789_vm10, %v2320_v59, %v1786_v5  ;;  %v1798_v8 = vmul.f32 %v2322_v6, %v1331_v61  ;;  %vm1803_vm12 = vweird.f32 %v2322_v6 }
 0x364   : > { %v1795_v9 = vsel %vm1792_vm11, %v1794_v26, %v1790_v7  ;;  %vm1804_vm14 = vmor %vm1802_vm13, %vm1803_vm12 }
 0x365   : > { %1842 = vst [vmem:[%s2624_s15 + $0xf0] sm:$0xff] %v1795_v9  ;;  %v1799_v10 = vsub.f32 1.0, %v1798_v8 }
 0x367   : > { %v1800_v12 = vmul.f32 %v2322_v6, %v1799_v10 }
 0x369   : > { %v1801_v14 = vadd.f32 %v2322_v6, %v1800_v12 }
 0x36b   : > { %v1805_v16 = vsel %vm1804_vm14, %v2322_v6, %v1801_v14 }
 0x36c   : > { %v1810_v17 = vsel %vm1807_vm15, %v1809_v15, %v1805_v16 }
 0x36d   : > { %1843 = vst [vmem:[%s2624_s15 + $0xf8] sm:$0xff] %v1810_v17 }
 0x36e PF: > { %s19_s30 = sadd.s32 1, %s2330_s30  }
 0x36f   : > { %p16_p4 = scmp.ge.s32.totalorder %s19_s30, 4  }
 0x371   :  { %18 = sbr.rel (!%p16_p4) target bundleno = 1 (0x1), region = 86 }

</bundles_post_ra>
